<compile_context>
chip_gen: v7x
topology: tpu7x:2x2x1
jax: 0.10.0
libtpu: 0.0.40
codegen_flags: <defaults>
</compile_context>

<pallas_src>
import functools

import jax
import jax.numpy as jnp
from jax.experimental import pallas as pl
from jax.experimental.pallas import tpu as pltpu


def _weight_kernel(x_ref, w1_ref, b1_ref, p2_ref, o_ref, logits_ref, *, layer2_on_vpu):
    # x_ref:     (N, G, TS)   input activations (batch dim squeezed by the BlockSpec)
    # w1_ref:    (hidden, G)  layer-1 weight, same dtype as x (bf16-native MXU path)
    # b1_ref:    (hidden, 1)  f32
    # p2_ref:    (G, hidden+2) f32 = [ w2^T | b2 | w3 ]
    # o_ref:     (N, TS)      softmax weights (input dtype)
    # logits_ref:(N, TS)      f32 VMEM scratch
    N, G, TS = x_ref.shape
    hidden = w1_ref.shape[0]
    f32 = jnp.float32

    # Tiny, constant-index_map parameter blocks: loaded once per grid step.
    w1 = w1_ref[...]                               # (hidden, G), activation dtype
    p2 = p2_ref[...]                               # (G, hidden+2) f32
    w2t = p2[:, :hidden]                           # (G, hidden)
    b2c = p2[:, hidden:hidden + 1]                 # (G, 1)
    w3c = p2[:, hidden + 1:hidden + 2]             # (G, 1)

    # Hoisted lane-broadcasts (emitted once, reused across the unrolled N loop).
    b1b = jnp.broadcast_to(b1_ref[...], (hidden, TS))   # (hidden, TS) f32
    b2b = jnp.broadcast_to(b2c, (G, TS))                # (G, TS) f32
    w3b = jnp.broadcast_to(w3c, (G, TS))                # (G, TS) f32

    if layer2_on_vpu:
        # Hoist the tiny per-column slices of w2^T out of both loops.
        w2_cols = [w2t[:, k:k + 1] for k in range(hidden)]

    for n in range(N):                 # N is small and static -> fully unrolled
        xn = x_ref[n]                  # (G, TS), lane-dense, NOT upcast before the MXU
        # Layer 1 on the MXU; accumulation in f32.
        h = jnp.dot(w1, xn, preferred_element_type=f32) + b1b      # (hidden, TS)
        h = jnp.maximum(h, 0.0)
        if layer2_on_vpu:
            # v5e slot-balance: K = hidden outer-product accumulate on the (idle) VPU,
            # leaving the saturated vmatmul slot for layer 1 only.
            g = b2b
            for k in range(hidden):
                g = g + w2_cols[k] * h[k:k + 1, :]                  # (G,1)*(1,TS)
        else:
            g = jnp.dot(w2t, h, preferred_element_type=f32) + b2b  # (G, TS)
        g = jnp.maximum(g, 0.0)
        # Layer 3 (output width 1): VPU multiply + sublane (XLU) reduce instead of a
        # degenerate 1-column MXU matmul.  b3 is constant over N -> cancels in softmax.
        logits_ref[pl.ds(n, 1), :] = jnp.sum(g * w3b, axis=0, keepdims=True)

    # Softmax over the N axis (dim=1 of the original 6-D tensor).
    t = logits_ref[...]                                  # (N, TS) f32
    m = jnp.max(t, axis=0, keepdims=True)
    e = jnp.exp(t - m)
    s = jnp.sum(e, axis=0, keepdims=True)
    inv = pl.reciprocal(s, approx=True)                  # EUP slot (effectively free)
    inv = inv * (2.0 - s * inv)                          # two Newton steps -> full f32
    inv = inv * (2.0 - s * inv)
    o_ref[...] = (e * inv).astype(o_ref.dtype)


def _num_tensorcores():
    """Best-effort TensorCores-per-device (2 on v7x megacore parts, else 1)."""
    try:
        kind = jax.devices()[0].device_kind.lower()
    except Exception:  # pragma: no cover - defensive
        return 1
    return 2 if "v7" in kind else 1


def _pick_tile(S, B, N, G, hidden, x_itemsize, out_itemsize, *,
               max_ts=8192, vmem_budget=24 << 20, num_tc=1):
    """Largest lane-aligned (multiple-of-128) spatial tile under a VMEM budget.

    The budget keeps the per-step footprint (double-buffered input/output blocks, the
    f32 logit scratch and the f32 intermediates) safely under the scoped VMEM limit we
    request (32 MiB), which is valid on v5e/v6e (128 MiB physical) and v7x (64 MiB).
    Ragged S (not a multiple of the tile) is handled by a cdiv grid with a masked
    boundary block rather than a full-row fallback.
    """
    if S <= 256:
        return S                       # tiny volume: one full-extent block

    def step_bytes(ts):
        inp = 2 * N * G * ts * x_itemsize          # double-buffered input block
        out = 2 * N * ts * out_itemsize            # double-buffered output block
        scratch = N * ts * 4                       # f32 logit scratch
        inter = (2 * hidden + 3 * G) * ts * 4      # h + g + hoisted broadcasts (rough)
        return inp + out + scratch + inter

    ts = max(128, min(max_ts, (S // 128) * 128))
    while ts > 128 and step_bytes(ts) > vmem_budget:
        ts -= 128
    # Megacore split only on multi-TC chips (v7x): guarantee >= 2 grid steps on any
    # 128-multiple so neither TensorCore sits idle.  Single-TC v5e/v6e skip this.
    if num_tc > 1 and B * ((S + ts - 1) // ts) < 2:
        half = max(128, ((S // 2 + 127) // 128) * 128)
        ts = min(ts, half)
    return ts


def basic_weight_module(vol, params, *, ts=None, layer2_on_vpu=False, x_buffers=2):
    """vol: (B, N, G, D, H, W) float32 or bfloat16.  Returns (B, N, 1, D, H, W).

    Feeding bf16 halves the dominant HBM stream (input reads are ~89% of traffic); the
    kernel consumes bf16 directly on the MXU (no per-element upcast) and emits the
    softmax weights in the same dtype.  `layer2_on_vpu=True` moves layer 2 off the MXU
    onto the VPU (recommended on v5e if a bundle dump confirms the vmatmul slot binds).
    `x_buffers=3` requests deeper input pipelining (v7x, if DMA latency becomes visible).
    """
    B, N, G, D, H, W = vol.shape
    S = D * H * W
    w1, b1, w2, b2, w3, b3 = params           # (G,h), (1,h), (h,G), (1,G), (G,1), (1,1)
    hidden = w1.shape[1]
    del b3  # constant over the softmax axis N -> cancels exactly under max-subtraction

    # Free reshape (merges contiguous trailing spatial dims); NO transpose -> no extra
    # HBM pass in front of the kernel.
    x = vol.reshape(B, N, G, S)

    # Tiny parameter re-layouts (a few KB).  Layer-1 weight in the activation dtype so a
    # bf16 input goes bf16 x bf16 -> f32 on the MXU; everything downstream stays f32.
    w1x = jnp.transpose(w1).astype(vol.dtype)                      # (hidden, G)
    b1c = jnp.transpose(b1).astype(jnp.float32)                    # (hidden, 1)
    p2 = jnp.concatenate(                                          # (G, hidden + 2)
        [jnp.transpose(w2), jnp.transpose(b2), w3], axis=1).astype(jnp.float32)

    if ts is None:
        ts = _pick_tile(S, B, N, G, hidden, x.dtype.itemsize, vol.dtype.itemsize,
                        num_tc=_num_tensorcores())
    assert ts == S or ts % 128 == 0, "tile must be lane-aligned (mult of 128) or full-extent"

    x_spec_kwargs = {}
    if x_buffers != 2:
        x_spec_kwargs["pipeline_mode"] = pl.Buffered(x_buffers)

    kernel = functools.partial(_weight_kernel, layer2_on_vpu=layer2_on_vpu)

    out = pl.pallas_call(
        kernel,
        out_shape=jax.ShapeDtypeStruct((B, N, S), vol.dtype),
        grid_spec=pltpu.PrefetchScalarGridSpec(
            num_scalar_prefetch=0,
            grid=(B, pl.cdiv(S, ts)),          # ragged S -> masked boundary block
            in_specs=[
                pl.BlockSpec((None, N, G, ts), lambda b, s: (b, 0, 0, s), **x_spec_kwargs),
                pl.BlockSpec((hidden, G), lambda b, s: (0, 0)),
                pl.BlockSpec((hidden, 1), lambda b, s: (0, 0)),
                pl.BlockSpec((G, hidden + 2), lambda b, s: (0, 0)),
            ],
            out_specs=pl.BlockSpec((None, N, ts), lambda b, s: (b, 0, s)),
            scratch_shapes=[pltpu.VMEM((N, ts), jnp.float32)],
        ),
        compiler_params=pltpu.CompilerParams(
            dimension_semantics=("parallel", "parallel"),
            vmem_limit_bytes=32 * 1024 * 1024,
        ),
    )(x, w1x, b1c, p2)

    # Restore spatial dims, insert size-1 channel dim -> (B, N, 1, D, H, W).
    return out.reshape(B, N, D, H, W)[:, :, None, :, :, :]


def _reference(vol, params):
    """Pure-JAX reference mirroring the PyTorch forward."""
    w1, b1, w2, b2, w3, b3 = params
    x = jnp.transpose(vol, (0, 1, 3, 4, 5, 2))            # (B,N,D,H,W,G)
    h = jax.nn.relu(x @ w1 + b1[0])
    g = jax.nn.relu(h @ w2 + b2[0])
    t = g @ w3 + b3[0]                                    # (B,N,D,H,W,1)
    sm = jax.nn.softmax(t, axis=1)
    return jnp.transpose(sm, (0, 1, 5, 2, 3, 4))          # (B,N,1,D,H,W)


def _init_params(key, groups, hidden):
    k1, k2, k3, k4, k5, k6 = jax.random.split(key, 6)
    # Deterministic synthetic weights (stored as (in, out); PyTorch Linear stores (out, in)).
    w1 = jax.random.normal(k1, (groups, hidden), jnp.float32) * 0.3
    b1 = jax.random.normal(k2, (1, hidden), jnp.float32) * 0.1
    w2 = jax.random.normal(k3, (hidden, groups), jnp.float32) * 0.3
    b2 = jax.random.normal(k4, (1, groups), jnp.float32) * 0.1
    w3 = jax.random.normal(k5, (groups, 1), jnp.float32) * 0.3
    b3 = jax.random.normal(k6, (1, 1), jnp.float32) * 0.1
    return (w1, b1, w2, b2, w3, b3)


if __name__ == "__main__":
    key = jax.random.PRNGKey(0)
    k_vol, k_par = jax.random.split(key)

    B, N, G, D, H, W = 2, 4, 8, 4, 16, 16     # S = D*H*W = 1024
    hidden = 16

    vol = jax.random.normal(k_vol, (B, N, G, D, H, W), jnp.float32)
    params = _init_params(k_par, G, hidden)
    ref = _reference(vol, params)

    # 1) default path (layers 1 & 2 on the MXU, f32 activations)
    out = jax.block_until_ready(basic_weight_module(vol, params))
    assert out.shape == (B, N, 1, D, H, W), out.shape
    assert jnp.allclose(out, ref, atol=1e-5, rtol=1e-5), float(jnp.max(jnp.abs(out - ref)))

    # 2) v5e slot-balanced path (layer 2 as VPU outer-product accumulate)
    out_vpu = jax.block_until_ready(basic_weight_module(vol, params, layer2_on_vpu=True))
    assert jnp.allclose(out_vpu, ref, atol=1e-5, rtol=1e-5), \
        float(jnp.max(jnp.abs(out_vpu - ref)))

    # 3) bf16 activations fed straight to the MXU (no per-element upcast, bf16 output)
    vol_bf16 = vol.astype(jnp.bfloat16)
    out_bf16 = jax.block_until_ready(basic_weight_module(vol_bf16, params))
    ref_bf16 = _reference(vol_bf16.astype(jnp.float32), params)
    assert jnp.allclose(out_bf16.astype(jnp.float32), ref_bf16, atol=2e-2), \
        float(jnp.max(jnp.abs(out_bf16.astype(jnp.float32) - ref_bf16)))

    # 4) ragged spatial size (S = 480, not a multiple of the 384-lane tile):
    #    cdiv grid + masked boundary block instead of the old full-row fallback.
    vol_r = jax.random.normal(k_vol, (1, 3, G, 2, 12, 20), jnp.float32)
    out_r = jax.block_until_ready(basic_weight_module(vol_r, params))
    ref_r = _reference(vol_r, params)
    assert out_r.shape == (1, 3, 1, 2, 12, 20), out_r.shape
    assert jnp.allclose(out_r, ref_r, atol=1e-5, rtol=1e-5), \
        float(jnp.max(jnp.abs(out_r - ref_r)))

    print("KERNEL_OK")
</pallas_src>

<mosaic_0001>
module attributes {stable_mosaic.version = 11 : i64} {
  func.func @_weight_kernel(%arg0: i32, %arg1: i32, %arg2: memref<1x4x8x1024xf32, #tpu.memory_space<vmem>>, %arg3: memref<16x8xf32, #tpu.memory_space<vmem>>, %arg4: memref<16x1xf32, #tpu.memory_space<vmem>>, %arg5: memref<8x18xf32, #tpu.memory_space<vmem>>, %arg6: memref<1x4x1024xf32, #tpu.memory_space<vmem>>, %arg7: memref<4x1024xf32, #tpu.memory_space<vmem>>) attributes {dimension_semantics = [#tpu.dimension_semantics<parallel>, #tpu.dimension_semantics<parallel>], iteration_bounds = array<i64: 2, 1>, scalar_prefetch = 0 : i64, scratch_operands = 1 : i64, tpu.core_type = #tpu.core_type<tc>, window_params = [{transform_indices = @transform_0, window_bounds = array<i64: 1, 4, 8, 1024>}, {pipeline_mode = #tpu.pipeline_mode<synchronous>, transform_indices = @transform_1, window_bounds = array<i64: 16, 8>}, {pipeline_mode = #tpu.pipeline_mode<synchronous>, transform_indices = @transform_2, window_bounds = array<i64: 16, 1>}, {pipeline_mode = #tpu.pipeline_mode<synchronous>, transform_indices = @transform_3, window_bounds = array<i64: 8, 18>}, {transform_indices = @transform_4, window_bounds = array<i64: 1, 4, 1024>}]} {
    %c0 = arith.constant 0 : index
    %c0_0 = arith.constant 0 : index
    %0 = vector.load %arg3[%c0, %c0_0] : memref<16x8xf32, #tpu.memory_space<vmem>>, vector<16x8xf32>
    %c0_1 = arith.constant 0 : index
    %c0_2 = arith.constant 0 : index
    %1 = vector.load %arg5[%c0_1, %c0_2] : memref<8x18xf32, #tpu.memory_space<vmem>>, vector<8x18xf32>
    %2 = vector.extract_strided_slice %1 {offsets = [0, 0], sizes = [8, 16], strides = [1, 1]} : vector<8x18xf32> to vector<8x16xf32>
    %3 = vector.extract_strided_slice %1 {offsets = [0, 16], sizes = [8, 1], strides = [1, 1]} : vector<8x18xf32> to vector<8x1xf32>
    %4 = vector.extract_strided_slice %1 {offsets = [0, 17], sizes = [8, 1], strides = [1, 1]} : vector<8x18xf32> to vector<8x1xf32>
    %c0_3 = arith.constant 0 : index
    %c0_4 = arith.constant 0 : index
    %5 = vector.load %arg4[%c0_3, %c0_4] : memref<16x1xf32, #tpu.memory_space<vmem>>, vector<16x1xf32>
    %6 = vector.shape_cast %5 : vector<16x1xf32> to vector<16x1xf32>
    %7 = vector.broadcast %6 : vector<16x1xf32> to vector<16x1024xf32>
    %8 = vector.shape_cast %3 : vector<8x1xf32> to vector<8x1xf32>
    %9 = vector.broadcast %8 : vector<8x1xf32> to vector<8x1024xf32>
    %10 = vector.shape_cast %4 : vector<8x1xf32> to vector<8x1xf32>
    %11 = vector.broadcast %10 : vector<8x1xf32> to vector<8x1024xf32>
    %c0_5 = arith.constant 0 : index
    %c0_6 = arith.constant 0 : index
    %c0_7 = arith.constant 0 : index
    %c0_8 = arith.constant 0 : index
    %12 = vector.load %arg2[%c0_5, %c0_6, %c0_7, %c0_8] : memref<1x4x8x1024xf32, #tpu.memory_space<vmem>>, vector<1x1x8x1024xf32>
    %13 = vector.shape_cast %12 : vector<1x1x8x1024xf32> to vector<8x1024xf32>
    %cst = arith.constant dense<0.000000e+00> : vector<16x1024xf32>
    %14 = tpu.matmul %0, %13, %cst {dimension_numbers = #tpu.dot_dimension_numbers<[1], [0], [0], [1], [0, 0, 1, 1], [], []>} : vector<16x8xf32>, vector<8x1024xf32>, vector<16x1024xf32> -> vector<16x1024xf32>
    %15 = arith.addf %14, %7 : vector<16x1024xf32>
    %cst_9 = arith.constant 0.000000e+00 : f32
    %16 = vector.broadcast %cst_9 : f32 to vector<16x1024xf32>
    %17 = arith.maximumf %15, %16 : vector<16x1024xf32>
    %cst_10 = arith.constant dense<0.000000e+00> : vector<8x1024xf32>
    %18 = tpu.matmul %2, %17, %cst_10 {dimension_numbers = #tpu.dot_dimension_numbers<[1], [0], [0], [1], [0, 0, 1, 1], [], []>} : vector<8x16xf32>, vector<16x1024xf32>, vector<8x1024xf32> -> vector<8x1024xf32>
    %19 = arith.addf %18, %9 : vector<8x1024xf32>
    %cst_11 = arith.constant 0.000000e+00 : f32
    %20 = vector.broadcast %cst_11 : f32 to vector<8x1024xf32>
    %21 = arith.maximumf %19, %20 : vector<8x1024xf32>
    %22 = arith.mulf %21, %11 : vector<8x1024xf32>
    %cst_12 = arith.constant dense<0.000000e+00> : vector<1024xf32>
    %23 = vector.multi_reduction <add>, %22, %cst_12 [0] : vector<8x1024xf32> to vector<1024xf32>
    %24 = vector.shape_cast %23 : vector<1024xf32> to vector<1x1024xf32>
    %c0_13 = arith.constant 0 : index
    %c0_14 = arith.constant 0 : index
    %25 = vector.load %arg7[%c0_13, %c0_14] : memref<4x1024xf32, #tpu.memory_space<vmem>>, vector<1x1024xf32>
    tpu.vector_store %arg7[%c0_13, %c0_14], %24 {strides = array<i32>} : memref<4x1024xf32, #tpu.memory_space<vmem>>, vector<1x1024xf32>,
    %c0_15 = arith.constant 0 : index
    %c1 = arith.constant 1 : index
    %c0_16 = arith.constant 0 : index
    %c0_17 = arith.constant 0 : index
    %26 = vector.load %arg2[%c0_15, %c1, %c0_16, %c0_17] : memref<1x4x8x1024xf32, #tpu.memory_space<vmem>>, vector<1x1x8x1024xf32>
    %27 = vector.shape_cast %26 : vector<1x1x8x1024xf32> to vector<8x1024xf32>
    %cst_18 = arith.constant dense<0.000000e+00> : vector<16x1024xf32>
    %28 = tpu.matmul %0, %27, %cst_18 {dimension_numbers = #tpu.dot_dimension_numbers<[1], [0], [0], [1], [0, 0, 1, 1], [], []>} : vector<16x8xf32>, vector<8x1024xf32>, vector<16x1024xf32> -> vector<16x1024xf32>
    %29 = arith.addf %28, %7 : vector<16x1024xf32>
    %cst_19 = arith.constant 0.000000e+00 : f32
    %30 = vector.broadcast %cst_19 : f32 to vector<16x1024xf32>
    %31 = arith.maximumf %29, %30 : vector<16x1024xf32>
    %cst_20 = arith.constant dense<0.000000e+00> : vector<8x1024xf32>
    %32 = tpu.matmul %2, %31, %cst_20 {dimension_numbers = #tpu.dot_dimension_numbers<[1], [0], [0], [1], [0, 0, 1, 1], [], []>} : vector<8x16xf32>, vector<16x1024xf32>, vector<8x1024xf32> -> vector<8x1024xf32>
    %33 = arith.addf %32, %9 : vector<8x1024xf32>
    %cst_21 = arith.constant 0.000000e+00 : f32
    %34 = vector.broadcast %cst_21 : f32 to vector<8x1024xf32>
    %35 = arith.maximumf %33, %34 : vector<8x1024xf32>
    %36 = arith.mulf %35, %11 : vector<8x1024xf32>
    %cst_22 = arith.constant dense<0.000000e+00> : vector<1024xf32>
    %37 = vector.multi_reduction <add>, %36, %cst_22 [0] : vector<8x1024xf32> to vector<1024xf32>
    %38 = vector.shape_cast %37 : vector<1024xf32> to vector<1x1024xf32>
    %c1_23 = arith.constant 1 : index
    %c0_24 = arith.constant 0 : index
    %39 = vector.load %arg7[%c1_23, %c0_24] : memref<4x1024xf32, #tpu.memory_space<vmem>>, vector<1x1024xf32>
    tpu.vector_store %arg7[%c1_23, %c0_24], %38 {strides = array<i32>} : memref<4x1024xf32, #tpu.memory_space<vmem>>, vector<1x1024xf32>,
    %c0_25 = arith.constant 0 : index
    %c2 = arith.constant 2 : index
    %c0_26 = arith.constant 0 : index
    %c0_27 = arith.constant 0 : index
    %40 = vector.load %arg2[%c0_25, %c2, %c0_26, %c0_27] : memref<1x4x8x1024xf32, #tpu.memory_space<vmem>>, vector<1x1x8x1024xf32>
    %41 = vector.shape_cast %40 : vector<1x1x8x1024xf32> to vector<8x1024xf32>
    %cst_28 = arith.constant dense<0.000000e+00> : vector<16x1024xf32>
    %42 = tpu.matmul %0, %41, %cst_28 {dimension_numbers = #tpu.dot_dimension_numbers<[1], [0], [0], [1], [0, 0, 1, 1], [], []>} : vector<16x8xf32>, vector<8x1024xf32>, vector<16x1024xf32> -> vector<16x1024xf32>
    %43 = arith.addf %42, %7 : vector<16x1024xf32>
    %cst_29 = arith.constant 0.000000e+00 : f32
    %44 = vector.broadcast %cst_29 : f32 to vector<16x1024xf32>
    %45 = arith.maximumf %43, %44 : vector<16x1024xf32>
    %cst_30 = arith.constant dense<0.000000e+00> : vector<8x1024xf32>
    %46 = tpu.matmul %2, %45, %cst_30 {dimension_numbers = #tpu.dot_dimension_numbers<[1], [0], [0], [1], [0, 0, 1, 1], [], []>} : vector<8x16xf32>, vector<16x1024xf32>, vector<8x1024xf32> -> vector<8x1024xf32>
    %47 = arith.addf %46, %9 : vector<8x1024xf32>
    %cst_31 = arith.constant 0.000000e+00 : f32
    %48 = vector.broadcast %cst_31 : f32 to vector<8x1024xf32>
    %49 = arith.maximumf %47, %48 : vector<8x1024xf32>
    %50 = arith.mulf %49, %11 : vector<8x1024xf32>
    %cst_32 = arith.constant dense<0.000000e+00> : vector<1024xf32>
    %51 = vector.multi_reduction <add>, %50, %cst_32 [0] : vector<8x1024xf32> to vector<1024xf32>
    %52 = vector.shape_cast %51 : vector<1024xf32> to vector<1x1024xf32>
    %c2_33 = arith.constant 2 : index
    %c0_34 = arith.constant 0 : index
    %53 = vector.load %arg7[%c2_33, %c0_34] : memref<4x1024xf32, #tpu.memory_space<vmem>>, vector<1x1024xf32>
    tpu.vector_store %arg7[%c2_33, %c0_34], %52 {strides = array<i32>} : memref<4x1024xf32, #tpu.memory_space<vmem>>, vector<1x1024xf32>,
    %c0_35 = arith.constant 0 : index
    %c3 = arith.constant 3 : index
    %c0_36 = arith.constant 0 : index
    %c0_37 = arith.constant 0 : index
    %54 = vector.load %arg2[%c0_35, %c3, %c0_36, %c0_37] : memref<1x4x8x1024xf32, #tpu.memory_space<vmem>>, vector<1x1x8x1024xf32>
    %55 = vector.shape_cast %54 : vector<1x1x8x1024xf32> to vector<8x1024xf32>
    %cst_38 = arith.constant dense<0.000000e+00> : vector<16x1024xf32>
    %56 = tpu.matmul %0, %55, %cst_38 {dimension_numbers = #tpu.dot_dimension_numbers<[1], [0], [0], [1], [0, 0, 1, 1], [], []>} : vector<16x8xf32>, vector<8x1024xf32>, vector<16x1024xf32> -> vector<16x1024xf32>
    %57 = arith.addf %56, %7 : vector<16x1024xf32>
    %cst_39 = arith.constant 0.000000e+00 : f32
    %58 = vector.broadcast %cst_39 : f32 to vector<16x1024xf32>
    %59 = arith.maximumf %57, %58 : vector<16x1024xf32>
    %cst_40 = arith.constant dense<0.000000e+00> : vector<8x1024xf32>
    %60 = tpu.matmul %2, %59, %cst_40 {dimension_numbers = #tpu.dot_dimension_numbers<[1], [0], [0], [1], [0, 0, 1, 1], [], []>} : vector<8x16xf32>, vector<16x1024xf32>, vector<8x1024xf32> -> vector<8x1024xf32>
    %61 = arith.addf %60, %9 : vector<8x1024xf32>
    %cst_41 = arith.constant 0.000000e+00 : f32
    %62 = vector.broadcast %cst_41 : f32 to vector<8x1024xf32>
    %63 = arith.maximumf %61, %62 : vector<8x1024xf32>
    %64 = arith.mulf %63, %11 : vector<8x1024xf32>
    %cst_42 = arith.constant dense<0.000000e+00> : vector<1024xf32>
    %65 = vector.multi_reduction <add>, %64, %cst_42 [0] : vector<8x1024xf32> to vector<1024xf32>
    %66 = vector.shape_cast %65 : vector<1024xf32> to vector<1x1024xf32>
    %c3_43 = arith.constant 3 : index
    %c0_44 = arith.constant 0 : index
    %67 = vector.load %arg7[%c3_43, %c0_44] : memref<4x1024xf32, #tpu.memory_space<vmem>>, vector<1x1024xf32>
    tpu.vector_store %arg7[%c3_43, %c0_44], %66 {strides = array<i32>} : memref<4x1024xf32, #tpu.memory_space<vmem>>, vector<1x1024xf32>,
    %c0_45 = arith.constant 0 : index
    %c0_46 = arith.constant 0 : index
    %68 = vector.load %arg7[%c0_45, %c0_46] : memref<4x1024xf32, #tpu.memory_space<vmem>>, vector<4x1024xf32>
    %cst_47 = arith.constant dense<0xFF800000> : vector<1024xf32>
    %69 = vector.multi_reduction <maximumf>, %68, %cst_47 [0] : vector<4x1024xf32> to vector<1024xf32>
    %70 = vector.shape_cast %69 : vector<1024xf32> to vector<1x1024xf32>
    %71 = vector.broadcast %70 : vector<1x1024xf32> to vector<4x1024xf32>
    %72 = arith.subf %68, %71 : vector<4x1024xf32>
    %73 = math.exp %72 : vector<4x1024xf32>
    %cst_48 = arith.constant dense<0.000000e+00> : vector<1024xf32>
    %74 = vector.multi_reduction <add>, %73, %cst_48 [0] : vector<4x1024xf32> to vector<1024xf32>
    %75 = vector.shape_cast %74 : vector<1024xf32> to vector<1x1024xf32>
    %76 = tpu.reciprocal %75 {approx = true} : vector<1x1024xf32> -> vector<1x1024xf32>
    %77 = arith.mulf %75, %76 : vector<1x1024xf32>
    %cst_49 = arith.constant 2.000000e+00 : f32
    %78 = vector.broadcast %cst_49 : f32 to vector<1x1024xf32>
    %79 = arith.subf %78, %77 : vector<1x1024xf32>
    %80 = arith.mulf %76, %79 : vector<1x1024xf32>
    %81 = arith.mulf %75, %80 : vector<1x1024xf32>
    %cst_50 = arith.constant 2.000000e+00 : f32
    %82 = vector.broadcast %cst_50 : f32 to vector<1x1024xf32>
    %83 = arith.subf %82, %81 : vector<1x1024xf32>
    %84 = arith.mulf %80, %83 : vector<1x1024xf32>
    %85 = vector.broadcast %84 : vector<1x1024xf32> to vector<4x1024xf32>
    %86 = arith.mulf %73, %85 : vector<4x1024xf32>
    %c0_51 = arith.constant 0 : index
    %c0_52 = arith.constant 0 : index
    %c0_53 = arith.constant 0 : index
    %87 = vector.load %arg6[%c0_51, %c0_52, %c0_53] : memref<1x4x1024xf32, #tpu.memory_space<vmem>>, vector<1x4x1024xf32>
    %88 = vector.shape_cast %87 : vector<1x4x1024xf32> to vector<4x1024xf32>
    %89 = vector.shape_cast %86 : vector<4x1024xf32> to vector<1x4x1024xf32>
    tpu.vector_store %arg6[%c0_51, %c0_52, %c0_53], %89 {strides = array<i32>} : memref<1x4x1024xf32, #tpu.memory_space<vmem>>, vector<1x4x1024xf32>,
    return
  }
  func.func @transform_0(%arg0: i32, %arg1: i32) -> (i32, i32, i32, i32) {
    %c0_i32 = arith.constant 0 : i32
    %c0_i32_0 = arith.constant 0 : i32
    %c0_i32_1 = arith.constant 0 : i32
    return %arg0, %c0_i32, %c0_i32_0, %arg1 : i32, i32, i32, i32
  }
  func.func @transform_1(%arg0: i32, %arg1: i32) -> (i32, i32) {
    %c0_i32 = arith.constant 0 : i32
    %c0_i32_0 = arith.constant 0 : i32
    %c0_i32_1 = arith.constant 0 : i32
    return %c0_i32, %c0_i32_0 : i32, i32
  }
  func.func @transform_2(%arg0: i32, %arg1: i32) -> (i32, i32) {
    %c0_i32 = arith.constant 0 : i32
    %c0_i32_0 = arith.constant 0 : i32
    %c0_i32_1 = arith.constant 0 : i32
    return %c0_i32, %c0_i32_0 : i32, i32
  }
  func.func @transform_3(%arg0: i32, %arg1: i32) -> (i32, i32) {
    %c0_i32 = arith.constant 0 : i32
    %c0_i32_0 = arith.constant 0 : i32
    %c0_i32_1 = arith.constant 0 : i32
    return %c0_i32, %c0_i32_0 : i32, i32
  }
  func.func @transform_4(%arg0: i32, %arg1: i32) -> (i32, i32, i32) {
    %c0_i32 = arith.constant 0 : i32
    %c0_i32_0 = arith.constant 0 : i32
    return %arg0, %c0_i32, %arg1 : i32, i32, i32
  }
}

</mosaic_0001>

<bundles_post_ra>
// kernel: tpu_custom_call.1
= control target key start
LH: loop header
LB: loop body
LE: loop exit
PB: predicated region body
PF: predicated region fallthrough
CT: control target
= control target key end

     0   :  { %9 = vsyncpa [#allocation4], 0  ;;  %s4588_s0 = inlined_call_operand.hbm [shape: f32[2,4,8,1024], index: 0, kind: input, shape index: {}]   ;;  %s4589_s1 = inlined_call_operand.vmem [shape: f32[16,8], index: 1, kind: input, shape index: {}]   ;;  %s4590_s2 = inlined_call_operand.vmem [shape: f32[16,1], index: 2, kind: input, shape index: {}]   ;;  %s4591_s3 = inlined_call_operand.vmem [shape: f32[8,18], index: 3, kind: input, shape index: {}]   ;;  %s4592_s4 = inlined_call_operand.hbm [shape: f32[2,4,1024], index: 4, kind: output, shape index: {}]  }
   0x1   :  { %11 = vsyncpa [#allocation4 + $0x1], 0 }
   0x2   :  { %12 = vsyncpa [#allocation5], 0 }
   0x3   :  { %14 = vsyncpa [#allocation5 + $0x1], 0  ;;  %s3987_s15 = smov 0   ;;  %s3989_s16 = smov 0  }
   0x4   :  { %s3991_s17 = smov 0   ;;  %s3993_s18 = smov 0  }
   0x5   :  { %s3995_s19 = smov 0   ;;  %s3997_s20 = smov 0  }
   0x6 LB: > { %s3582_s21 = sadd.s32 4294967295, %s3951_s20   ;;  %s3583_s22 = sadd.s32 4294967294, %s3951_s20   ;;  %s3951_s20 = sphi %s3997_s20, %s20_s20   ;;  %s3947_s19 = sphi %s3995_s19, %s4607_s19   ;;  %s3943_s18 = sphi %s3993_s18, %s4606_s18   ;;  %s3939_s17 = sphi %s3991_s17, %s4605_s17   ;;  %s3935_s16 = sphi %s3989_s16, %s4604_s16   ;;  %s3931_s15 = sphi %s3987_s15, %s4603_s15  }
   0x7   : > { %s32_s23 = sadd.s32 1, %s3947_s19  ;;  %s41_s24 = sadd.s32 1, %s3939_s17 }
   0x8   : > { %p34_p0 = scmp.ge.s32.totalorder %s32_s23, 2  ;;  %p48_p1 = scmp.ne.s32.totalorder %s3939_s17, %s3935_s16 }
   0x9   : > { %p49_p2 = scmp.eq.s32.totalorder %s3951_s20, 0  ;;  %p54_p3 = scmp.ne.s32.totalorder %s3935_s16, %s3931_s15 }
   0xa   : > { %s4609_s23 = smov (%p34_p0, %s32_s23), 0  ;;  %p55_p5 = scmp.eq.s32.totalorder %s3582_s21, 0 }
   0xb   : > { %p4028_p4 = por %p49_p2, %p48_p1  ;;  %s36_s26 = ssub.s32 %s3947_s19, %s4609_s23 }
   0xc   : > { %p143_p6 = scmp.eq.s32.totalorder %s3582_s21, 1  ;;  %p39_p7 = scmp.eq.s32.totalorder %s36_s26, 0 }
   0xd   : > { %p4034_p8 = por %p55_p5, %p54_p3  ;;  %p149_p10 = scmp.eq.s32.totalorder %s3583_s22, 1 }
   0xe   : > { %p4038_p9 = por %p143_p6, %p48_p1  ;;  %p3747_p13 = scmp.lt.s32.totalorder %s3951_s20, 2 }
   0xf   : > { %s4043_s29 = scalar_select %p39_p7, %s3939_s17, %s41_s24  }
  0x10   : > { %s4596_s28 = scalar_select %p4038_p9, 1, 0 }
  0x11   : > { %p4045_p11 = por %p149_p10, %p54_p3  ;;  %s178_s5 = sand.u32 1, %s3939_s17  }
  0x12   : > { %s3586_s6 = sshll.u32 %s178_s5, 8  ;;  %s3669_s7 = sshll.u32 %s3947_s19, 12 }
  0x13   : > { %s4597_s30 = scalar_select %p4045_p11, 1, 0 }
  0x14   : > { %s4056_s10 = scalar_lea.hbm %s4588_s0, %s3669_s7  ;;  %s182_s11 = scalar_lea.vmem [#allocation3], %s3586_s6 }
  0x15   : > { %s191_s12 = sshll.u32 %s182_s11, 4  ;;  %p4062_p0 = pnand %p3747_p13, %p4028_p4  ;;  %s4058_s12 = int_to_ptr.vmem [resolvable:$true] %s191_s12 }
  0x16   : > { %s4067_s14 = scalar_lea.sflag [#allocation4], %s178_s5  ;;  %s3839_s21 = scalar_lea.hbm %s4056_s10, 4096 }
  0x17   : > { %p3840_p2 = scmp.ne.s32.totalorder %s4056_s10, %s3839_s21  ;;  %p3841_p3 = pneg %p4062_p0 }
  0x18   : > { %s3844_s25 = scalar_lea.hbm %s4588_s0, 8192  ;;  %p3845_p4 = scmp.lt.u32.totalorder %s4056_s10, %s4588_s0 }
  0x19   : > { %p3842_p5 = pnand %p3841_p3, %p3840_p2  ;;  %p3846_p7 = scmp.lt.u32.totalorder %s3844_s25, %s3839_s21 }
  0x1a   : > { %p3848_p13 = scmp.lt.u32.totalorder %s3839_s21, %s4056_s10 }
  0x1b   : > { %p3843_p6 = pneg %p3842_p5  ;;  %p3847_p10 = por %p3846_p7, %p3845_p4 }
  0x1d   : > { %p3849_p12 = por %p3848_p13, %p3847_p10 }
  0x1f   : > { %p3850_p1 = pnand %p3849_p12, %p3843_p6 }
  0x21   : > { %3853 = shalt.err (!%p3850_p1)
}
  0x22   : > { %s3854_s5 = scalar_lea.vmem %s4058_s12, 4096  ;;  %s3953_s7 = smov [#allocation3]  }
  0x23   : > { %p3855_p2 = scmp.ne.s32.totalorder %s4058_s12, %s3854_s5  ;;  %s3859_s8 = sshll.u32 %s3953_s7, 4  ;;  %s3860_s8 = int_to_ptr.vmem [resolvable:$false] %s3859_s8 }
  0x24   : > { %s3861_s9 = scalar_lea.vmem %s3860_s8, 8192  ;;  %p3862_p9 = scmp.lt.s32.totalorder %s4058_s12, %s3860_s8 }
  0x25   : > { %p3857_p5 = pnand %p3855_p2, %p3841_p3  ;;  %p3863_p4 = scmp.lt.s32.totalorder %s3861_s9, %s3854_s5 }
  0x27   : > { %p3858_p11 = pneg %p3857_p5  ;;  %p3864_p7 = por %p3863_p4, %p3862_p9 }
  0x29   : > { %p3865_p10 = pnand %p3864_p7, %p3858_p11 }
  0x2b   : > { %3868 = shalt.err (!%p3865_p10)
}
  0x2c   : > { %s3954_s11 = smov 1024   ;;  %s3955_s21 = smov 64  }
  0x2d   : > { %3742 = dma.hbm_to_vmem [thread:$0]  (!%p4062_p0), %s4056_s10, 4096, %s4058_s12, %s4067_s14, %s3954_s11, %s3954_s11, %s3955_s21  }
  0x2e   : > { %p199_p12 = scmp.lt.s32.totalorder %s3951_s20, 3  ;;  %p4599_p1 = scmp.ge.s32.totalorder %s3951_s20, 1 }
  0x30   : > { %p200_p3 = pnand %p4599_p1, %p199_p12 }
  0x31   : > { %s4099_s22 = sand.u32 (!%p200_p3), 1, %s3935_s16  }
  0x32   : > { %203 = sbr.rel (%p200_p3) target bundleno = 1380 (0x564), region = 36  ;;  %s3590_s24 = sshll.u32 (!%p200_p3), %s4099_s22, 8 }
  0x33   : > { %s206_s25 = scalar_lea.sflag (!%p200_p3), [#allocation4], %s4099_s22  ;;  %s4103_s26 = scalar_lea.vmem (!%p200_p3), [#allocation3], %s3590_s24 }
  0x39   : > { %3922 = dma.done.wait (%p4034_p8), %s206_s25, 4096  }
  0x3a   : > { %3924 = vsyncadd (%p4034_p8), %s206_s25, 4294963200  ;;  %v3956_v0 = vmov 0.0   ;;  %v3957_v1 = vmov 0   ;;  %v261_v2 = vld [vmem:[%s4103_s26 + $0x8] sm:$0xff]  ;;  %v263_v3 = vld [vmem:[%s4103_s26 + $0x18] sm:$0xff]  ;;  %vm268_vm0 = vcmask 64512  }
  0x3b   : > { %339 = vmatprep.mubr.f32.mxu0 %v3956_v0  ;;  %416 = vmatprep.mubr.f32.mxu1 %v3956_v0  ;;  %v260_v4 = vld [vmem:[%s4103_s26] sm:$0xff]  ;;  %v262_v5 = vld [vmem:[%s4103_s26 + $0x10] sm:$0xff]  ;;  %v265_v7 = vld [vmem:[%s4103_s26 + $0x28] sm:$0xff]  ;;  %v3958_v15 = vmov 16   ;;  %v3959_v16 = vmov 17   ;;  %vm599_vm1 = vcmask 130048  }
  0x3c   : > { %3804 = vset.pattern.permute.xlu0 %v3957_v1  ;;  %275 = vmatprep.subr.mxu0 %v261_v2  ;;  %v4118_v6 = vld [vmem:[%s4589_s1] sm:$0xff]  ;;  %v267_v8 = vld [vmem:[%s4103_s26 + $0x38] sm:$0xff]  ;;  %v266_v10 = vld [vmem:[%s4103_s26 + $0x30] sm:$0xff]  ;;  %vm3248_vm2 = vcmask 1043456   ;;  %s3591_s10 = sshll.u32 %s4099_s22, 5  ;;  %s3670_s13 = sshll.u32 %s3943_s18, 9 }
  0x3d   : > { %352 = vmatprep.subr.mxu1 %v263_v3  ;;  %276 = vmatpush1.msra.mxu0 %v260_v4  ;;  %v264_v9 = vld [vmem:[%s4103_s26 + $0x20] sm:$0xff]  ;;  %v4131_v11 = vld [vmem:[%s4589_s1 + $0x8] sm:$0xff]  ;;  %s233_s12 = scalar_lea.vmem [#allocation6], %s3591_s10  ;;  %s4539_s7 = scalar_lea.hbm %s4592_s4, %s3670_s13 }
  0x3e   : > { %353 = vmatpush1.msra.mxu1 %v262_v5  ;;  %3592 = vmatmul.mubr.msk.f32.vlgmr.msra.gmra.mrb[0].mxu0 %vm268_vm0, %v4118_v6  ;;  %v239_v12 = vld [vmem:[%s4590_s2] sm:$0xff]  ;;  %v240_v13 = vld [vmem:[%s4590_s2 + $0x8] sm:$0xff]  ;;  %s3498_s14 = sshll.u32 %s233_s12, 4  ;;  %s3482_s8 = scalar_lea.sflag [#allocation5], %s4099_s22  ;;  %s4541_s14 = int_to_ptr.vmem [resolvable:$true] %s3498_s14 }
  0x3f   : > { %3594 = vmatmul.mubr.msk.f32.vlgmr.msra.gmra.mrb[0].mxu1 %vm268_vm0, %v4118_v6  ;;  %429 = vmatprep.subr.mxu0 %v265_v7  ;;  %v4162_v14 = vld [vmem:[%s4591_s3] sm:$0xff]  ;;  %s3869_s9 = scalar_lea.vmem %s4541_s14, 512  ;;  %p4600_p9 = scmp.ne.s32.totalorder %s4596_s28, 0 }
  0x40   : > { %506 = vmatprep.subr.mxu1 %v267_v8  ;;  %430 = vmatpush1.msra.mxu0 %v264_v9  ;;  %p3870_p8 = scmp.ne.s32.totalorder %s4541_s14, %s3869_s9  ;;  %s3961_s18 = smov [#allocation6]  }
  0x41   : > { %507 = vmatpush1.msra.mxu1 %v266_v10  ;;  %345 = vmatprep.mubr.f32.mxu0 %v3956_v0  ;;  %s3873_s11 = sshll.u32 %s3961_s18, 4  ;;  %s3874_s11 = int_to_ptr.vmem [resolvable:$false] %s3873_s11 }
  0x42   : > { %422 = vmatprep.mubr.f32.mxu1 %v3956_v0  ;;  %3593 = vmatmul.mubr.msk.f32.gmra.mrb[2].mxu0 %vm268_vm0, %v4131_v11  ;;  %p3871_p11 = pnand %p3870_p8, %p4600_p9  ;;  %s3875_s21 = scalar_lea.vmem %s3874_s11, 1024 }
  0x43   : > { %3595 = vmatmul.mubr.msk.f32.gmra.mrb[2].mxu1 %vm268_vm0, %v4131_v11  ;;  %493 = vmatprep.mubr.f32.mxu0 %v3956_v0  ;;  %p3876_p6 = scmp.lt.s32.totalorder %s4541_s14, %s3874_s11  ;;  %p3877_p13 = scmp.lt.s32.totalorder %s3875_s21, %s3869_s9 }
  0x44   : > { %570 = vmatprep.mubr.f32.mxu1 %v3956_v0  ;;  %243 = vperm.xlu0 %3804, %v239_v12   ;;  %p3872_p0 = pneg %p3871_p11 }
  0x45   : > { %3805 = vset.pattern.permute.xlu1 %v3958_v15  ;;  %v3605_v15 = vld [vmem:[%s4103_s26 + $0x48] sm:$0xff]  ;;  %p3878_p2 = por %p3877_p13, %p3876_p6 }
  0x46   : > { %3596 = vmatmul.mubr.msk.f32.vlgmr.msra.gmra.mrb[4].mxu0 %vm268_vm0, %v4118_v6  ;;  %253 = vperm.xlu1 %3805, %v4162_v14  }
  0x47   : > { %3598 = vmatmul.mubr.msk.f32.vlgmr.msra.gmra.mrb[4].mxu1 %vm268_vm0, %v4118_v6  ;;  %499 = vmatprep.mubr.f32.mxu0 %v3956_v0  ;;  %p3879_p5 = pnand %p3878_p2, %p3872_p0 }
  0x48   : > { %576 = vmatprep.mubr.f32.mxu1 %v3956_v0  ;;  %248 = vperm.xlu0 %3804, %v240_v13  }
  0x4a   : > { %3597 = vmatmul.mubr.msk.f32.gmra.mrb[6].mxu0 %vm268_vm0, %v4131_v11  ;;  %3806 = vset.pattern.permute.xlu1 %v3959_v16 }
  0x4b   : > { %3599 = vmatmul.mubr.msk.f32.gmra.mrb[6].mxu1 %vm268_vm0, %v4131_v11  ;;  %666 = vmatprep.mubr.f32.mxu0 %v3956_v0 }
  0x4c   : > { %737 = vmatprep.mubr.f32.mxu1 %v3956_v0  ;;  %3807 = vset.pattern.permute.xlu0 %v3959_v16  ;;  %v3607_v16 = vld [vmem:[%s4103_s26 + $0x58] sm:$0xff] }
  0x4d   : > { %257 = vperm.xlu1 %3806, %v4162_v14  }
  0xc3   : > { %v4166_v17 = vpop.permute.xlu0 %243 }
  0xc7   : > { %v4168_v22 = vpop.permute.xlu0 %248 }
 0x111   : > { %v341_v18 = vpop.f32.mrb[0].mxu0 }
 0x112   : > { %v418_v19 = vpop.f32.mrb[0].mxu1  ;;  %v343_v20 = vpop.f32.mrb[1].mxu0  ;;  %v342_v23 = vadd.f32 %v341_v18, %v4166_v17  ;;  %v3604_v18 = vld [vmem:[%s4103_s26 + $0x40] sm:$0xff] }
 0x113   : > { %v420_v21 = vpop.f32.mrb[1].mxu1  ;;  %v419_v24 = vadd.f32 %v418_v19, %v4166_v17  ;;  %v344_v25 = vadd.f32 %v343_v20, %v4166_v17  ;;  %v3606_v19 = vld [vmem:[%s4103_s26 + $0x50] sm:$0xff]  ;;  %v3609_v20 = vld [vmem:[%s4103_s26 + $0x68] sm:$0xff] }
 0x114   : > { %v421_v26 = vadd.f32 %v420_v21, %v4166_v17  ;;  %v583_v35 = vmax.f32 %v342_v23, 0.0  ;;  %v3611_v21 = vld [vmem:[%s4103_s26 + $0x78] sm:$0xff]  ;;  %v3608_v23 = vld [vmem:[%s4103_s26 + $0x60] sm:$0xff] }
 0x115   : > { %v347_v27 = vpop.f32.mrb[2].mxu0  ;;  %v585_v36 = vmax.f32 %v419_v24, 0.0  ;;  %v584_v39 = vmax.f32 %v344_v25, 0.0  ;;  %v3610_v24 = vld [vmem:[%s4103_s26 + $0x70] sm:$0xff]  ;;  %v4230_v25 = vpop.permute.xlu1 %253 }
 0x116   : > { %v424_v28 = vpop.f32.mrb[2].mxu1  ;;  %v348_v29 = vadd.f32 %v347_v27, %v4168_v22  ;;  %v349_v31 = vpop.f32.mrb[3].mxu0  ;;  %v586_v40 = vmax.f32 %v421_v26, 0.0 }
 0x117   : > { %v425_v30 = vadd.f32 %v424_v28, %v4168_v22  ;;  %v426_v32 = vpop.f32.mrb[3].mxu1  ;;  %v350_v33 = vadd.f32 %v349_v31, %v4168_v22  ;;  %v3960_v28 = vmov 1966171168  }
 0x118   : > { %v427_v34 = vadd.f32 %v426_v32, %v4168_v22  ;;  %v591_v37 = vmax.f32 %v348_v29, 0.0  ;;  %v963_v29 = vunpack.c.l.s4 %v3960_v28 }
 0x119   : > { %v593_v38 = vmax.f32 %v425_v30, 0.0  ;;  %v592_v41 = vmax.f32 %v350_v33, 0.0  ;;  %v495_v43 = vpop.f32.mrb[4].mxu0  ;;  %v965_v30 = vlaneseq }
 0x11a   : > { %v594_v42 = vmax.f32 %v427_v34, 0.0  ;;  %v572_v44 = vpop.f32.mrb[4].mxu1  ;;  %v3673_v45 = vpack.c.bf16 %v591_v37, %v583_v35  ;;  %v497_v47 = vpop.f32.mrb[5].mxu0  ;;  %v496_v51 = vadd.f32 %v495_v43, %v4166_v17 }
 0x11b   : > { %v3677_v46 = vpack.c.bf16 %v593_v38, %v585_v36  ;;  %v574_v48 = vpop.f32.mrb[5].mxu1  ;;  %v3671_v49 = vpack.c.bf16 %v592_v41, %v584_v39  ;;  %v573_v52 = vadd.f32 %v572_v44, %v4166_v17  ;;  %v498_v53 = vadd.f32 %v497_v47, %v4166_v17  ;;  %v4236_v37 = vpop.permute.xlu1 %257 }
 0x11c   : > { %v3675_v50 = vpack.c.bf16 %v594_v42, %v586_v40  ;;  %v575_v54 = vadd.f32 %v574_v48, %v4166_v17  ;;  %v587_v63 = vmax.f32 %v496_v51, 0.0  ;;  %v964_v42 = vunpack.c.0.s8 %v963_v29 }
 0x11d   : > { %v501_v55 = vpop.f32.mrb[6].mxu0  ;;  %3672 = vmatprep.subr.bf16.mxu0 %v3671_v49  ;;  %v589_v1 = vmax.f32 %v573_v52, 0.0  ;;  %v588_v4 = vmax.f32 %v498_v53, 0.0  ;;  %v966_v43 = vshrl.u32 %v965_v30, 7 }
 0x11e   : > { %v578_v56 = vpop.f32.mrb[6].mxu1  ;;  %3676 = vmatprep.subr.bf16.mxu1 %v3675_v50  ;;  %v502_v57 = vadd.f32 %v501_v55, %v4168_v22  ;;  %v503_v59 = vpop.f32.mrb[7].mxu0  ;;  %3674 = vmatpush1.bf16.msra.mxu0 %v3673_v45  ;;  %v590_v5 = vmax.f32 %v575_v54, 0.0 }
 0x11f   : > { %v579_v58 = vadd.f32 %v578_v56, %v4168_v22  ;;  %v580_v60 = vpop.f32.mrb[7].mxu1  ;;  %3678 = vmatpush1.bf16.msra.mxu1 %v3677_v46  ;;  %v504_v61 = vadd.f32 %v503_v59, %v4168_v22  ;;  %v4242_v52 = vsub.s32 %v964_v42, %v966_v43 }
 0x120   : > { %v581_v62 = vadd.f32 %v580_v60, %v4168_v22  ;;  %v595_v2 = vmax.f32 %v502_v57, 0.0 }
 0x121   : > { %v597_v3 = vmax.f32 %v579_v58, 0.0  ;;  %v596_v7 = vmax.f32 %v504_v61, 0.0  ;;  %3600 = vmatmul.mubr.msk.f32.vlgmr.msra.gmra.mrb[8].mxu0 %vm599_vm1, %v4162_v14 }
 0x122   : > { %v598_v8 = vmax.f32 %v581_v62, 0.0  ;;  %3601 = vmatmul.mubr.msk.f32.vlgmr.msra.gmra.mrb[8].mxu1 %vm599_vm1, %v4162_v14  ;;  %v3681_v9 = vpack.c.bf16 %v595_v2, %v587_v63  ;;  %808 = vmatprep.mubr.f32.mxu0 %v3956_v0 }
 0x123   : > { %v3685_v10 = vpack.c.bf16 %v597_v3, %v589_v1  ;;  %879 = vmatprep.mubr.f32.mxu1 %v3956_v0  ;;  %v3679_v12 = vpack.c.bf16 %v596_v7, %v588_v4 }
 0x124   : > { %v3683_v13 = vpack.c.bf16 %v598_v8, %v590_v5 }
 0x125   : > { %3680 = vmatprep.subr.bf16.mxu0 %v3679_v12 }
 0x126   : > { %3684 = vmatprep.subr.bf16.mxu1 %v3683_v13  ;;  %3682 = vmatpush1.bf16.msra.mxu0 %v3681_v9 }
 0x127   : > { %3686 = vmatpush1.bf16.msra.mxu1 %v3685_v10  ;;  %1018 = vmatprep.subr.mxu0 %v3605_v15 }
 0x128   : > { %1095 = vmatprep.subr.mxu1 %v3607_v16 }
 0x129   : > { %3602 = vmatmul.mubr.msk.f32.vlgmr.msra.gmra.mrb[10].mxu0 %vm599_vm1, %v4162_v14 }
 0x12a   : > { %3603 = vmatmul.mubr.msk.f32.vlgmr.msra.gmra.mrb[10].mxu1 %vm599_vm1, %v4162_v14  ;;  %1019 = vmatpush1.msra.mxu0 %v3604_v18 }
 0x12b   : > { %1096 = vmatpush1.msra.mxu1 %v3606_v19  ;;  %1082 = vmatprep.mubr.f32.mxu0 %v3956_v0 }
 0x12c   : > { %1159 = vmatprep.mubr.f32.mxu1 %v3956_v0  ;;  %1172 = vmatprep.subr.mxu0 %v3609_v20 }
 0x12d   : > { %1249 = vmatprep.subr.mxu1 %v3611_v21  ;;  %3612 = vmatmul.mubr.msk.f32.vlgmr.msra.gmra.mrb[12].mxu0 %vm268_vm0, %v4118_v6 }
 0x12e   : > { %3614 = vmatmul.mubr.msk.f32.vlgmr.msra.gmra.mrb[12].mxu1 %vm268_vm0, %v4118_v6  ;;  %1173 = vmatpush1.msra.mxu0 %v3608_v23 }
 0x12f   : > { %1250 = vmatpush1.msra.mxu1 %v3610_v24  ;;  %1088 = vmatprep.mubr.f32.mxu0 %v3956_v0 }
 0x130   : > { %1165 = vmatprep.mubr.f32.mxu1 %v3956_v0 }
 0x131   : > { %3613 = vmatmul.mubr.msk.f32.gmra.mrb[14].mxu0 %vm268_vm0, %v4131_v11 }
 0x132   : > { %3615 = vmatmul.mubr.msk.f32.gmra.mrb[14].mxu1 %vm268_vm0, %v4131_v11  ;;  %1236 = vmatprep.mubr.f32.mxu0 %v3956_v0 }
 0x133   : > { %1313 = vmatprep.mubr.f32.mxu1 %v3956_v0 }
 0x135   : > { %3616 = vmatmul.mubr.msk.f32.vlgmr.msra.gmra.mrb[16].mxu0 %vm268_vm0, %v4118_v6 }
 0x136   : > { %3618 = vmatmul.mubr.msk.f32.vlgmr.msra.gmra.mrb[16].mxu1 %vm268_vm0, %v4118_v6  ;;  %1242 = vmatprep.mubr.f32.mxu0 %v3956_v0 }
 0x137   : > { %1319 = vmatprep.mubr.f32.mxu1 %v3956_v0 }
 0x139   : > { %3617 = vmatmul.mubr.msk.f32.gmra.mrb[18].mxu0 %vm268_vm0, %v4131_v11 }
 0x13a   : > { %3619 = vmatmul.mubr.msk.f32.gmra.mrb[18].mxu1 %vm268_vm0, %v4131_v11  ;;  %1406 = vmatprep.mubr.f32.mxu0 %v3956_v0 }
 0x13b   : > { %1477 = vmatprep.mubr.f32.mxu1 %v3956_v0 }
 0x1f4   : > { %v668_v26 = vpop.f32.mrb[8].mxu0 }
 0x1f5   : > { %v739_v27 = vpop.f32.mrb[8].mxu1  ;;  %v669_v31 = vadd.f32 %v668_v26, %v4230_v25  ;;  %v670_v33 = vpop.f32.mrb[9].mxu0 }
 0x1f6   : > { %v740_v32 = vadd.f32 %v739_v27, %v4230_v25  ;;  %v741_v34 = vpop.f32.mrb[9].mxu1  ;;  %v671_v35 = vadd.f32 %v670_v33, %v4230_v25 }
 0x1f7   : > { %v742_v36 = vadd.f32 %v741_v34, %v4230_v25  ;;  %v886_v38 = vmax.f32 %v669_v31, 0.0 }
 0x1f8   : > { %v888_v39 = vmax.f32 %v740_v32, 0.0  ;;  %v887_v40 = vmax.f32 %v671_v35, 0.0 }
 0x1f9   : > { %v889_v41 = vmax.f32 %v742_v36, 0.0  ;;  %v894_v44 = vmul.f32 %v886_v38, %v4236_v37 }
 0x1fa   : > { %v896_v45 = vmul.f32 %v888_v39, %v4236_v37  ;;  %v895_v46 = vmul.f32 %v887_v40, %v4236_v37 }
 0x1fb   : > { %v897_v47 = vmul.f32 %v889_v41, %v4236_v37  ;;  %v902_v48 = vrot.slane %v894_v44, 4 }
 0x1fc   : > { %v914_v49 = vrot.slane %v896_v45, 4  ;;  %v810_v50 = vpop.f32.mrb[10].mxu0  ;;  %v908_v53 = vrot.slane %v895_v46, 4 }
 0x1fd   : > { %v881_v51 = vpop.f32.mrb[10].mxu1  ;;  %v920_v54 = vrot.slane %v897_v47, 4  ;;  %v811_v55 = vadd.f32 %v810_v50, %v4230_v25  ;;  %v812_v57 = vpop.f32.mrb[11].mxu0  ;;  %v903_v59 = vadd.f32 %v902_v48, %v894_v44 }
 0x1fe   : > { %v882_v56 = vadd.f32 %v881_v51, %v4230_v25  ;;  %v883_v58 = vpop.f32.mrb[11].mxu1  ;;  %v915_v60 = vadd.f32 %v914_v49, %v896_v45  ;;  %v813_v61 = vadd.f32 %v812_v57, %v4230_v25  ;;  %v909_v63 = vadd.f32 %v908_v53, %v895_v46 }
 0x1ff   : > { %v884_v62 = vadd.f32 %v883_v58, %v4230_v25  ;;  %v921_v1 = vadd.f32 %v920_v54, %v897_v47  ;;  %v890_v2 = vmax.f32 %v811_v55, 0.0  ;;  %v904_v4 = vrot.slane %v903_v59, 2 }
 0x200   : > { %v892_v3 = vmax.f32 %v882_v56, 0.0  ;;  %v916_v5 = vrot.slane %v915_v60, 2  ;;  %v891_v7 = vmax.f32 %v813_v61, 0.0  ;;  %v910_v9 = vrot.slane %v909_v63, 2  ;;  %v1084_v12 = vpop.f32.mrb[12].mxu0 }
 0x201   : > { %v893_v8 = vmax.f32 %v884_v62, 0.0  ;;  %v922_v10 = vrot.slane %v921_v1, 2  ;;  %v1161_v13 = vpop.f32.mrb[12].mxu1  ;;  %v898_v15 = vmul.f32 %v890_v2, %v4236_v37  ;;  %v905_v18 = vadd.f32 %v904_v4, %v903_v59  ;;  %v1086_v20 = vpop.f32.mrb[13].mxu0 }
 0x202   : > { %v900_v16 = vmul.f32 %v892_v3, %v4236_v37  ;;  %v917_v19 = vadd.f32 %v916_v5, %v915_v60  ;;  %v1163_v21 = vpop.f32.mrb[13].mxu1  ;;  %v899_v23 = vmul.f32 %v891_v7, %v4236_v37  ;;  %v911_v26 = vadd.f32 %v910_v9, %v909_v63 }
 0x203   : > { %v901_v24 = vmul.f32 %v893_v8, %v4236_v37  ;;  %v923_v27 = vadd.f32 %v922_v10, %v921_v1  ;;  %v926_v28 = vrot.slane %v898_v15, 4  ;;  %v906_v30 = vrot.slane %v905_v18, 1 }
 0x204   : > { %v938_v29 = vrot.slane %v900_v16, 4  ;;  %v918_v31 = vrot.slane %v917_v19, 1  ;;  %v932_v32 = vrot.slane %v899_v23, 4  ;;  %v912_v33 = vrot.slane %v911_v26, 1  ;;  %v1090_v36 = vpop.f32.mrb[14].mxu0 }
 0x205   : > { %v924_v34 = vrot.slane %v923_v27, 1  ;;  %v944_v35 = vrot.slane %v901_v24, 4  ;;  %v1167_v38 = vpop.f32.mrb[14].mxu1  ;;  %v927_v39 = vadd.f32 %v926_v28, %v898_v15  ;;  %v907_v41 = vadd.f32 %v906_v30, %v905_v18  ;;  %v1092_v43 = vpop.f32.mrb[15].mxu0 }
 0x206   : > { %v939_v40 = vadd.f32 %v938_v29, %v900_v16  ;;  %v919_v42 = vadd.f32 %v918_v31, %v917_v19  ;;  %v1169_v44 = vpop.f32.mrb[15].mxu1  ;;  %v933_v45 = vadd.f32 %v932_v32, %v899_v23  ;;  %v913_v46 = vadd.f32 %v912_v33, %v911_v26 }
 0x207   : > { %v925_v47 = vadd.f32 %v924_v34, %v923_v27  ;;  %v945_v48 = vadd.f32 %v944_v35, %v901_v24  ;;  %v928_v49 = vrot.slane %v927_v39, 2  ;;  %v1085_v60 = vadd.f32 %v1084_v12, %v4166_v17 }
 0x208   : > { %v940_v50 = vrot.slane %v939_v40, 2  ;;  %v934_v51 = vrot.slane %v933_v45, 2  ;;  %v958_v54 = vcombine.low %v907_v41, %v913_v46  ;;  %v1238_v56 = vpop.f32.mrb[16].mxu0  ;;  %v1162_v61 = vadd.f32 %v1161_v13, %v4166_v17 }
 0x209   : > { %v946_v53 = vrot.slane %v945_v48, 2  ;;  %v959_v55 = vcombine.low %v919_v42, %v925_v47  ;;  %v1315_v57 = vpop.f32.mrb[16].mxu1  ;;  %v929_v58 = vadd.f32 %v928_v49, %v927_v39  ;;  %v1240_v62 = vpop.f32.mrb[17].mxu0  ;;  %v1087_v8 = vadd.f32 %v1086_v20, %v4166_v17 }
 0x20a   : > { %v941_v59 = vadd.f32 %v940_v50, %v939_v40  ;;  %v1317_v63 = vpop.f32.mrb[17].mxu1  ;;  %v935_v1 = vadd.f32 %v934_v51, %v933_v45  ;;  %v968_v3 = vrot.slane %v958_v54, %v4242_v52  ;;  %v1164_v9 = vadd.f32 %v1163_v21, %v4166_v17 }
 0x20b   : > { %v947_v2 = vadd.f32 %v946_v53, %v945_v48  ;;  %v975_v4 = vrot.slane %v959_v55, %v4242_v52  ;;  %v930_v5 = vrot.slane %v929_v58, 1  ;;  %v1091_v12 = vadd.f32 %v1090_v36, %v4168_v22 }
 0x20c   : > { %v942_v7 = vrot.slane %v941_v59, 1  ;;  %v936_v10 = vrot.slane %v935_v1, 1  ;;  %v1244_v13 = vpop.f32.mrb[18].mxu0  ;;  %v1326_v24 = vmax.f32 %v1085_v60, 0.0  ;;  %v1328_v30 = vmax.f32 %v1162_v61, 0.0 }
 0x20d   : > { %v948_v15 = vrot.slane %v947_v2, 1  ;;  %v990_v16 = vcombine.low %v968_v3, %v975_v4  ;;  %v1321_v18 = vpop.f32.mrb[18].mxu1  ;;  %v931_v19 = vadd.f32 %v930_v5, %v929_v58  ;;  %v1246_v26 = vpop.f32.mrb[19].mxu0  ;;  %v1334_v31 = vmax.f32 %v1091_v12, 0.0  ;;  %v3626_v12 = vld [vmem:[%s4103_s26 + $0x90] sm:$0xff] }
 0x20e   : > { %v943_v23 = vadd.f32 %v942_v7, %v941_v59  ;;  %v1323_v27 = vpop.f32.mrb[19].mxu1  ;;  %v937_v28 = vadd.f32 %v936_v10, %v935_v1  ;;  %v1327_v32 = vmax.f32 %v1087_v8, 0.0  ;;  %v1168_v20 = vadd.f32 %v1167_v38, %v4168_v22  ;;  %v3625_v10 = vld [vmem:[%s4103_s26 + $0x88] sm:$0xff] }
 0x20f   : > { %v949_v29 = vadd.f32 %v948_v15, %v947_v2  ;;  %v1093_v21 = vadd.f32 %v1092_v43, %v4168_v22  ;;  %v1170_v33 = vadd.f32 %v1169_v44, %v4168_v22  ;;  %v1329_v36 = vmax.f32 %v1164_v9, 0.0  ;;  %v3627_v15 = vld [vmem:[%s4103_s26 + $0x98] sm:$0xff] }
 0x210   : > { %v960_v34 = vcombine.low %v931_v19, %v937_v28  ;;  %v3689_v39 = vpack.c.bf16 %v1334_v31, %v1326_v24  ;;  %v1336_v40 = vmax.f32 %v1168_v20, 0.0  ;;  %v1239_v45 = vadd.f32 %v1238_v56, %v4166_v17  ;;  %v3628_v19 = vld [vmem:[%s4103_s26 + $0xa0] sm:$0xff] }
 0x211   : > { %v961_v35 = vcombine.low %v943_v23, %v949_v29  ;;  %v1335_v41 = vmax.f32 %v1093_v21, 0.0  ;;  %v1337_v42 = vmax.f32 %v1170_v33, 0.0  ;;  %v1316_v48 = vadd.f32 %v1315_v57, %v4166_v17  ;;  %v3630_v23 = vld [vmem:[%s4103_s26 + $0xb0] sm:$0xff] }
 0x212   : > { %v982_v46 = vrot.slane %v960_v34, %v4242_v52  ;;  %v1241_v38 = vadd.f32 %v1240_v62, %v4166_v17  ;;  %v3693_v43 = vpack.c.bf16 %v1336_v40, %v1328_v30  ;;  %v1318_v50 = vadd.f32 %v1317_v63, %v4166_v17 }
 0x213   : > { %v989_v47 = vrot.slane %v961_v35, %v4242_v52  ;;  %v3687_v49 = vpack.c.bf16 %v1335_v41, %v1327_v32  ;;  %v3691_v44 = vpack.c.bf16 %v1337_v42, %v1329_v36  ;;  %v1245_v53 = vadd.f32 %v1244_v13, %v4168_v22  ;;  %v3629_v13 = vld [vmem:[%s4103_s26 + $0xa8] sm:$0xff] }
 0x214   : > { %v1322_v54 = vadd.f32 %v1321_v18, %v4168_v22  ;;  %v998_v55 = vrot.slane %v990_v16, %v4242_v52  ;;  %v1330_v56 = vmax.f32 %v1239_v45, 0.0  ;;  %v1247_v58 = vadd.f32 %v1246_v26, %v4168_v22  ;;  %v3624_v16 = vld [vmem:[%s4103_s26 + $0x80] sm:$0xff]  ;;  %v3631_v18 = vld [vmem:[%s4103_s26 + $0xb8] sm:$0xff] }
 0x215   : > { %v991_v51 = vcombine.low %v982_v46, %v989_v47  ;;  %3688 = vmatprep.subr.bf16.mxu0 %v3687_v49  ;;  %3692 = vmatprep.subr.bf16.mxu1 %v3691_v44  ;;  %v1324_v57 = vadd.f32 %v1323_v27, %v4168_v22  ;;  %v1332_v60 = vmax.f32 %v1316_v48, 0.0  ;;  %v1338_v61 = vmax.f32 %v1245_v53, 0.0 }
 0x216   : > { %v1340_v62 = vmax.f32 %v1322_v54, 0.0  ;;  %3690 = vmatpush1.bf16.msra.mxu0 %v3689_v39  ;;  %3694 = vmatpush1.bf16.msra.mxu1 %v3693_v43  ;;  %v1331_v63 = vmax.f32 %v1241_v38, 0.0  ;;  %v1333_v1 = vmax.f32 %v1318_v50, 0.0  ;;  %v1339_v2 = vmax.f32 %v1247_v58, 0.0 }
 0x217   : > { %v1005_v59 = vrot.slane %v991_v51, %v4242_v52  ;;  %v1341_v3 = vmax.f32 %v1324_v57, 0.0  ;;  %v3697_v5 = vpack.c.bf16 %v1338_v61, %v1330_v56 }
 0x218   : > { %v3701_v7 = vpack.c.bf16 %v1340_v62, %v1332_v60  ;;  %v3695_v8 = vpack.c.bf16 %v1339_v2, %v1331_v63 }
 0x219   : > { %v1006_v4 = vcombine.low %v998_v55, %v1005_v59  ;;  %v3699_v9 = vpack.c.bf16 %v1341_v3, %v1333_v1  ;;  %3620 = vmatmul.mubr.msk.f32.vlgmr.msra.gmra.mrb[20].mxu0 %vm599_vm1, %v4162_v14  ;;  %3621 = vmatmul.mubr.msk.f32.vlgmr.msra.gmra.mrb[20].mxu1 %vm599_vm1, %v4162_v14 }
 0x21a   : > { %1548 = vmatprep.mubr.f32.mxu0 %v3956_v0  ;;  %1619 = vmatprep.mubr.f32.mxu1 %v3956_v0 }
 0x21b   : > { %1008 = vst [vmem:[#allocation2] ss:$4 sm:$0xff] %v1006_v4  ;;  %3696 = vmatprep.subr.bf16.mxu0 %v3695_v8  ;;  %3700 = vmatprep.subr.bf16.mxu1 %v3699_v9 }
 0x21c   : > { %3698 = vmatpush1.bf16.msra.mxu0 %v3697_v5  ;;  %3702 = vmatpush1.bf16.msra.mxu1 %v3701_v7 }
 0x21d   : > { %1759 = vmatprep.subr.mxu0 %v3625_v10  ;;  %1836 = vmatprep.subr.mxu1 %v3627_v15 }
 0x21f   : > { %3622 = vmatmul.mubr.msk.f32.vlgmr.msra.gmra.mrb[22].mxu0 %vm599_vm1, %v4162_v14  ;;  %3623 = vmatmul.mubr.msk.f32.vlgmr.msra.gmra.mrb[22].mxu1 %vm599_vm1, %v4162_v14 }
 0x220   : > { %1760 = vmatpush1.msra.mxu0 %v3624_v16  ;;  %1837 = vmatpush1.msra.mxu1 %v3626_v12 }
 0x221   : > { %1823 = vmatprep.mubr.f32.mxu0 %v3956_v0  ;;  %1900 = vmatprep.mubr.f32.mxu1 %v3956_v0 }
 0x222   : > { %1913 = vmatprep.subr.mxu0 %v3629_v13  ;;  %1990 = vmatprep.subr.mxu1 %v3631_v18 }
 0x223   : > { %3632 = vmatmul.mubr.msk.f32.vlgmr.msra.gmra.mrb[24].mxu0 %vm268_vm0, %v4118_v6  ;;  %3634 = vmatmul.mubr.msk.f32.vlgmr.msra.gmra.mrb[24].mxu1 %vm268_vm0, %v4118_v6 }
 0x224   : > { %1914 = vmatpush1.msra.mxu0 %v3628_v19  ;;  %1991 = vmatpush1.msra.mxu1 %v3630_v23 }
 0x225   : > { %1829 = vmatprep.mubr.f32.mxu0 %v3956_v0  ;;  %1906 = vmatprep.mubr.f32.mxu1 %v3956_v0 }
 0x227   : > { %3633 = vmatmul.mubr.msk.f32.gmra.mrb[26].mxu0 %vm268_vm0, %v4131_v11  ;;  %3635 = vmatmul.mubr.msk.f32.gmra.mrb[26].mxu1 %vm268_vm0, %v4131_v11 }
 0x228   : > { %1977 = vmatprep.mubr.f32.mxu0 %v3956_v0  ;;  %2054 = vmatprep.mubr.f32.mxu1 %v3956_v0 }
 0x22b   : > { %3636 = vmatmul.mubr.msk.f32.vlgmr.msra.gmra.mrb[28].mxu0 %vm268_vm0, %v4118_v6  ;;  %3638 = vmatmul.mubr.msk.f32.vlgmr.msra.gmra.mrb[28].mxu1 %vm268_vm0, %v4118_v6 }
 0x22c   : > { %1983 = vmatprep.mubr.f32.mxu0 %v3956_v0  ;;  %2060 = vmatprep.mubr.f32.mxu1 %v3956_v0 }
 0x22f   : > { %3637 = vmatmul.mubr.msk.f32.gmra.mrb[30].mxu0 %vm268_vm0, %v4131_v11  ;;  %3639 = vmatmul.mubr.msk.f32.gmra.mrb[30].mxu1 %vm268_vm0, %v4131_v11 }
 0x230   : > { %2147 = vmatprep.mubr.f32.mxu0 %v3956_v0  ;;  %2218 = vmatprep.mubr.f32.mxu1 %v3956_v0 }
 0x2ec   : > { %v1408_v24 = vpop.f32.mrb[20].mxu0  ;;  %v1479_v26 = vpop.f32.mrb[20].mxu1 }
 0x2ed   : > { %v1409_v27 = vadd.f32 %v1408_v24, %v4230_v25  ;;  %v1480_v6 = vadd.f32 %v1479_v26, %v4230_v25  ;;  %v1410_v28 = vpop.f32.mrb[21].mxu0  ;;  %v1481_v29 = vpop.f32.mrb[21].mxu1 }
 0x2ee   : > { %v1411_v30 = vadd.f32 %v1410_v28, %v4230_v25  ;;  %v1482_v31 = vadd.f32 %v1481_v29, %v4230_v25 }
 0x2ef   : > { %v1626_v32 = vmax.f32 %v1409_v27, 0.0  ;;  %v1628_v20 = vmax.f32 %v1480_v6, 0.0 }
 0x2f0   : > { %v1627_v21 = vmax.f32 %v1411_v30, 0.0  ;;  %v1629_v11 = vmax.f32 %v1482_v31, 0.0 }
 0x2f1   : > { %v1634_v33 = vmul.f32 %v1626_v32, %v4236_v37  ;;  %v1636_v34 = vmul.f32 %v1628_v20, %v4236_v37 }
 0x2f2   : > { %v1635_v35 = vmul.f32 %v1627_v21, %v4236_v37  ;;  %v1637_v36 = vmul.f32 %v1629_v11, %v4236_v37  ;;  %v1550_v39 = vpop.f32.mrb[22].mxu0  ;;  %v1621_v40 = vpop.f32.mrb[22].mxu1 }
 0x2f3   : > { %v1642_v41 = vrot.slane %v1634_v33, 4  ;;  %v1654_v42 = vrot.slane %v1636_v34, 4  ;;  %v1551_v45 = vadd.f32 %v1550_v39, %v4230_v25  ;;  %v1622_v46 = vadd.f32 %v1621_v40, %v4230_v25  ;;  %v1552_v47 = vpop.f32.mrb[23].mxu0  ;;  %v1623_v48 = vpop.f32.mrb[23].mxu1 }
 0x2f4   : > { %v1648_v38 = vrot.slane %v1635_v35, 4  ;;  %v1660_v43 = vrot.slane %v1637_v36, 4  ;;  %v1553_v49 = vadd.f32 %v1552_v47, %v4230_v25  ;;  %v1624_v44 = vadd.f32 %v1623_v48, %v4230_v25 }
 0x2f5   : > { %v1643_v50 = vadd.f32 %v1642_v41, %v1634_v33  ;;  %v1655_v51 = vadd.f32 %v1654_v42, %v1636_v34  ;;  %v1630_v53 = vmax.f32 %v1551_v45, 0.0  ;;  %v1632_v54 = vmax.f32 %v1622_v46, 0.0 }
 0x2f6   : > { %v1649_v55 = vadd.f32 %v1648_v38, %v1635_v35  ;;  %v1661_v56 = vadd.f32 %v1660_v43, %v1637_v36  ;;  %v1631_v58 = vmax.f32 %v1553_v49, 0.0  ;;  %v1633_v57 = vmax.f32 %v1624_v44, 0.0  ;;  %v1825_v59 = vpop.f32.mrb[24].mxu0  ;;  %v1902_v60 = vpop.f32.mrb[24].mxu1 }
 0x2f7   : > { %v1644_v61 = vrot.slane %v1643_v50, 2  ;;  %v1656_v62 = vrot.slane %v1655_v51, 2  ;;  %v1638_v63 = vmul.f32 %v1630_v53, %v4236_v37  ;;  %v1640_v1 = vmul.f32 %v1632_v54, %v4236_v37  ;;  %v1827_v2 = vpop.f32.mrb[25].mxu0  ;;  %v4332_v3 = vpop.f32.mrb[25].mxu1 }
 0x2f8   : > { %v1650_v4 = vrot.slane %v1649_v55, 2  ;;  %v1662_v5 = vrot.slane %v1661_v56, 2  ;;  %v1639_v7 = vmul.f32 %v1631_v58, %v4236_v37  ;;  %v1641_v8 = vmul.f32 %v1633_v57, %v4236_v37 }
 0x2f9   : > { %v1645_v9 = vadd.f32 %v1644_v61, %v1643_v50  ;;  %v1657_v10 = vadd.f32 %v1656_v62, %v1655_v51  ;;  %v1666_v15 = vrot.slane %v1638_v63, 4  ;;  %v1678_v16 = vrot.slane %v1640_v1, 4 }
 0x2fa   : > { %v1651_v12 = vadd.f32 %v1650_v4, %v1649_v55  ;;  %v1663_v13 = vadd.f32 %v1662_v5, %v1661_v56  ;;  %v1672_v18 = vrot.slane %v1639_v7, 4  ;;  %v1684_v19 = vrot.slane %v1641_v8, 4  ;;  %v1831_v23 = vpop.f32.mrb[26].mxu0  ;;  %v1908_v24 = vpop.f32.mrb[26].mxu1 }
 0x2fb   : > { %v1646_v26 = vrot.slane %v1645_v9, 1  ;;  %v1658_v27 = vrot.slane %v1657_v10, 1  ;;  %v1667_v6 = vadd.f32 %v1666_v15, %v1638_v63  ;;  %v1679_v28 = vadd.f32 %v1678_v16, %v1640_v1  ;;  %v1833_v29 = vpop.f32.mrb[27].mxu0  ;;  %v1910_v30 = vpop.f32.mrb[27].mxu1 }
 0x2fc   : > { %v1652_v31 = vrot.slane %v1651_v12, 1  ;;  %v1664_v32 = vrot.slane %v1663_v13, 1  ;;  %v1673_v20 = vadd.f32 %v1672_v18, %v1639_v7  ;;  %v1685_v21 = vadd.f32 %v1684_v19, %v1641_v8 }
 0x2fd   : > { %v1647_v11 = vadd.f32 %v1646_v26, %v1645_v9  ;;  %v1659_v33 = vadd.f32 %v1658_v27, %v1657_v10  ;;  %v1668_v34 = vrot.slane %v1667_v6, 2  ;;  %v1680_v35 = vrot.slane %v1679_v28, 2 }
 0x2fe   : > { %v1653_v36 = vadd.f32 %v1652_v31, %v1651_v12  ;;  %v1665_v39 = vadd.f32 %v1664_v32, %v1663_v13  ;;  %v1674_v40 = vrot.slane %v1673_v20, 2  ;;  %v1686_v41 = vrot.slane %v1685_v21, 2  ;;  %v1979_v42 = vpop.f32.mrb[28].mxu0  ;;  %v2056_v45 = vpop.f32.mrb[28].mxu1 }
 0x2ff   : > { %v1669_v46 = vadd.f32 %v1668_v34, %v1667_v6  ;;  %v1681_v47 = vadd.f32 %v1680_v35, %v1679_v28  ;;  %v1826_v48 = vadd.f32 %v1825_v59, %v4166_v17  ;;  %v1981_v38 = vpop.f32.mrb[29].mxu0  ;;  %v2058_v43 = vpop.f32.mrb[29].mxu1  ;;  %v1903_v55 = vadd.f32 %v1902_v60, %v4166_v17 }
 0x300   : > { %v1698_v49 = vcombine.low %v1647_v11, %v1653_v36  ;;  %v1699_v44 = vcombine.low %v1659_v33, %v1665_v39  ;;  %v1675_v50 = vadd.f32 %v1674_v40, %v1673_v20  ;;  %v1687_v51 = vadd.f32 %v1686_v41, %v1685_v21 }
 0x301   : > { %v1670_v53 = vrot.slane %v1669_v46, 1  ;;  %v1682_v54 = vrot.slane %v1681_v47, 1  ;;  %v2067_v4 = vmax.f32 %v1826_v48, 0.0  ;;  %v1828_v5 = vadd.f32 %v1827_v2, %v4166_v17 }
 0x302   : > { %v1708_v56 = vrot.slane %v1698_v49, %v4242_v52  ;;  %v1715_v58 = vrot.slane %v1699_v44, %v4242_v52  ;;  %v1676_v57 = vrot.slane %v1675_v50, 1  ;;  %v1688_v61 = vrot.slane %v1687_v51, 1  ;;  %v1985_v62 = vpop.f32.mrb[30].mxu0  ;;  %v2062_v63 = vpop.f32.mrb[30].mxu1 }
 0x303   : > { %v1671_v1 = vadd.f32 %v1670_v53, %v1669_v46  ;;  %v1683_v59 = vadd.f32 %v1682_v54, %v1681_v47  ;;  %v1987_v7 = vpop.f32.mrb[31].mxu0  ;;  %v2064_v8 = vpop.f32.mrb[31].mxu1  ;;  %v1832_v60 = vadd.f32 %v1831_v23, %v4168_v22  ;;  %v2069_v16 = vmax.f32 %v1903_v55, 0.0 }
 0x304   : > { %v1730_v9 = vcombine.low %v1708_v56, %v1715_v58  ;;  %v1677_v10 = vadd.f32 %v1676_v57, %v1675_v50  ;;  %v1689_v15 = vadd.f32 %v1688_v61, %v1687_v51  ;;  %v1905_v12 = vadd.f32 %v4332_v3, %v4166_v17  ;;  %v3645_v57 = vld [vmem:[%s4103_s26 + $0xc8] sm:$0xff]  ;;  %v3647_v61 = vld [vmem:[%s4103_s26 + $0xd8] sm:$0xff] }
 0x305   : > { %v1909_v13 = vadd.f32 %v1908_v24, %v4168_v22  ;;  %v1834_v18 = vadd.f32 %v1833_v29, %v4168_v22  ;;  %v2068_v27 = vmax.f32 %v1828_v5, 0.0  ;;  %v2075_v6 = vmax.f32 %v1832_v60, 0.0  ;;  %v3650_v5 = vld [vmem:[%s4103_s26 + $0xf0] sm:$0xff] }
 0x306   : > { %v1700_v19 = vcombine.low %v1671_v1, %v1677_v10  ;;  %v1701_v26 = vcombine.low %v1683_v59, %v1689_v15  ;;  %v1911_v31 = vadd.f32 %v1910_v30, %v4168_v22  ;;  %v1980_v32 = vadd.f32 %v1979_v42, %v4166_v17  ;;  %v3649_v1 = vld [vmem:[%s4103_s26 + $0xe8] sm:$0xff]  ;;  %v3651_v59 = vld [vmem:[%s4103_s26 + $0xf8] sm:$0xff] }
 0x307   : > { %v2077_v2 = vmax.f32 %v1909_v13, 0.0  ;;  %v2076_v28 = vmax.f32 %v1834_v18, 0.0  ;;  %v3705_v21 = vpack.c.bf16 %v2075_v6, %v2067_v4  ;;  %v2057_v3 = vadd.f32 %v2056_v45, %v4166_v17  ;;  %v3648_v4 = vld [vmem:[%s4103_s26 + $0xe0] sm:$0xff] }
 0x308   : > { %v1722_v23 = vrot.slane %v1700_v19, %v4242_v52  ;;  %v1729_v20 = vrot.slane %v1701_v26, %v4242_v52  ;;  %v2070_v24 = vmax.f32 %v1905_v12, 0.0  ;;  %v2078_v33 = vmax.f32 %v1911_v31, 0.0 }
 0x309   : > { %v3709_v11 = vpack.c.bf16 %v2077_v2, %v2069_v16  ;;  %v3703_v29 = vpack.c.bf16 %v2076_v28, %v2068_v27  ;;  %v1738_v34 = vrot.slane %v1730_v9, %v4242_v52  ;;  %v1982_v36 = vadd.f32 %v1981_v38, %v4166_v17 }
 0x30a   : > { %v1731_v35 = vcombine.low %v1722_v23, %v1729_v20  ;;  %v2059_v30 = vadd.f32 %v2058_v43, %v4166_v17  ;;  %v3707_v39 = vpack.c.bf16 %v2078_v33, %v2070_v24  ;;  %v1986_v40 = vadd.f32 %v1985_v62, %v4168_v22  ;;  %v3644_v62 = vld [vmem:[%s4103_s26 + $0xc0] sm:$0xff] }
 0x30b   : > { %v2063_v41 = vadd.f32 %v2062_v63, %v4168_v22  ;;  %3704 = vmatprep.subr.bf16.mxu0 %v3703_v29  ;;  %v1988_v42 = vadd.f32 %v1987_v7, %v4168_v22  ;;  %v2071_v46 = vmax.f32 %v1980_v32, 0.0  ;;  %v2073_v47 = vmax.f32 %v2057_v3, 0.0  ;;  %v3646_v63 = vld [vmem:[%s4103_s26 + $0xd0] sm:$0xff]  ;;  %v3836_v7 = vld [vmem:[%s4589_s1] sm:$0xff] }
 0x30c   : > { %v1745_v45 = vrot.slane %v1731_v35, %v4242_v52  ;;  %v2065_v48 = vadd.f32 %v2064_v8, %v4168_v22  ;;  %3706 = vmatpush1.bf16.msra.mxu0 %v3705_v21  ;;  %v2072_v49 = vmax.f32 %v1982_v36, 0.0  ;;  %v2079_v44 = vmax.f32 %v1986_v40, 0.0  ;;  %3708 = vmatprep.subr.bf16.mxu1 %v3707_v39 }
 0x30d   : > { %v2081_v38 = vmax.f32 %v2063_v41, 0.0  ;;  %v2080_v43 = vmax.f32 %v1988_v42, 0.0  ;;  %v2074_v51 = vmax.f32 %v2059_v30, 0.0  ;;  %3710 = vmatpush1.bf16.msra.mxu1 %v3709_v11 }
 0x30e   : > { %v1746_v50 = vcombine.low %v1738_v34, %v1745_v45  ;;  %v2082_v53 = vmax.f32 %v2065_v48, 0.0  ;;  %v3713_v54 = vpack.c.bf16 %v2079_v44, %v2071_v46 }
 0x30f   : > { %v3717_v55 = vpack.c.bf16 %v2081_v38, %v2073_v47  ;;  %v3711_v56 = vpack.c.bf16 %v2080_v43, %v2072_v49  ;;  %3640 = vmatmul.mubr.msk.f32.vlgmr.msra.gmra.mrb[32].mxu0 %vm599_vm1, %v4162_v14 }
 0x310   : > { %1749 = vst [vmem:[#allocation2 + $0x1] ss:$4 sm:$0xff] %v1746_v50  ;;  %v3715_v58 = vpack.c.bf16 %v2082_v53, %v2074_v51  ;;  %2289 = vmatprep.mubr.f32.mxu0 %v3956_v0  ;;  %3641 = vmatmul.mubr.msk.f32.vlgmr.msra.gmra.mrb[32].mxu1 %vm599_vm1, %v4162_v14 }
 0x311   : > { %3712 = vmatprep.subr.bf16.mxu0 %v3711_v56  ;;  %2360 = vmatprep.mubr.f32.mxu1 %v3956_v0 }
 0x312   : > { %3716 = vmatprep.subr.bf16.mxu1 %v3715_v58  ;;  %3714 = vmatpush1.bf16.msra.mxu0 %v3713_v54 }
 0x313   : > { %3718 = vmatpush1.bf16.msra.mxu1 %v3717_v55  ;;  %2500 = vmatprep.subr.mxu0 %v3645_v57 }
 0x314   : > { %2577 = vmatprep.subr.mxu1 %v3647_v61 }
 0x315   : > { %3642 = vmatmul.mubr.msk.f32.vlgmr.msra.gmra.mrb[34].mxu0 %vm599_vm1, %v4162_v14 }
 0x316   : > { %3643 = vmatmul.mubr.msk.f32.vlgmr.msra.gmra.mrb[34].mxu1 %vm599_vm1, %v4162_v14  ;;  %2501 = vmatpush1.msra.mxu0 %v3644_v62  ;;  %v3837_v14 = vld [vmem:[%s4589_s1 + $0x8] sm:$0xff] }
 0x317   : > { %2578 = vmatpush1.msra.mxu1 %v3646_v63  ;;  %2564 = vmatprep.mubr.f32.mxu0 %v3956_v0 }
 0x318   : > { %2641 = vmatprep.mubr.f32.mxu1 %v3956_v0  ;;  %2654 = vmatprep.subr.mxu0 %v3649_v1 }
 0x319   : > { %3652 = vmatmul.mubr.msk.f32.vlgmr.msra.gmra.mrb[36].mxu0 %vm268_vm0, %v3836_v7  ;;  %2731 = vmatprep.subr.mxu1 %v3651_v59 }
 0x31a   : > { %3654 = vmatmul.mubr.msk.f32.vlgmr.msra.gmra.mrb[36].mxu1 %vm268_vm0, %v3836_v7  ;;  %2655 = vmatpush1.msra.mxu0 %v3648_v4 }
 0x31b   : > { %2732 = vmatpush1.msra.mxu1 %v3650_v5  ;;  %2570 = vmatprep.mubr.f32.mxu0 %v3956_v0 }
 0x31c   : > { %2647 = vmatprep.mubr.f32.mxu1 %v3956_v0 }
 0x31d   : > { %3653 = vmatmul.mubr.msk.f32.gmra.mrb[38].mxu0 %vm268_vm0, %v3837_v14 }
 0x31e   : > { %3655 = vmatmul.mubr.msk.f32.gmra.mrb[38].mxu1 %vm268_vm0, %v3837_v14  ;;  %2718 = vmatprep.mubr.f32.mxu0 %v3956_v0 }
 0x31f   : > { %2795 = vmatprep.mubr.f32.mxu1 %v3956_v0 }
 0x321   : > { %3656 = vmatmul.mubr.msk.f32.vlgmr.msra.gmra.mrb[40].mxu0 %vm268_vm0, %v3836_v7 }
 0x322   : > { %3658 = vmatmul.mubr.msk.f32.vlgmr.msra.gmra.mrb[40].mxu1 %vm268_vm0, %v3836_v7  ;;  %2724 = vmatprep.mubr.f32.mxu0 %v3956_v0 }
 0x323   : > { %2801 = vmatprep.mubr.f32.mxu1 %v3956_v0 }
 0x325   : > { %3657 = vmatmul.mubr.msk.f32.gmra.mrb[42].mxu0 %vm268_vm0, %v3837_v14 }
 0x326   : > { %3659 = vmatmul.mubr.msk.f32.gmra.mrb[42].mxu1 %vm268_vm0, %v3837_v14  ;;  %2888 = vmatprep.mubr.f32.mxu0 %v3956_v0 }
 0x327   : > { %2959 = vmatprep.mubr.f32.mxu1 %v3956_v0 }
 0x3e2   : > { %v2149_v8 = vpop.f32.mrb[32].mxu0 }
 0x3e3   : > { %v2150_v9 = vadd.f32 %v2149_v8, %v4230_v25  ;;  %v2151_v10 = vpop.f32.mrb[33].mxu0  ;;  %v2220_v15 = vpop.f32.mrb[32].mxu1 }
 0x3e4   : > { %v2152_v60 = vadd.f32 %v2151_v10, %v4230_v25  ;;  %v2221_v12 = vadd.f32 %v2220_v15, %v4230_v25  ;;  %v2222_v13 = vpop.f32.mrb[33].mxu1 }
 0x3e5   : > { %v2367_v16 = vmax.f32 %v2150_v9, 0.0  ;;  %v2223_v19 = vadd.f32 %v2222_v13, %v4230_v25 }
 0x3e6   : > { %v2368_v18 = vmax.f32 %v2152_v60, 0.0  ;;  %v2369_v27 = vmax.f32 %v2221_v12, 0.0 }
 0x3e7   : > { %v2375_v26 = vmul.f32 %v2367_v16, %v4236_v37  ;;  %v2370_v2 = vmax.f32 %v2223_v19, 0.0 }
 0x3e8   : > { %v2376_v6 = vmul.f32 %v2368_v18, %v4236_v37  ;;  %v2291_v28 = vpop.f32.mrb[34].mxu0  ;;  %v2377_v32 = vmul.f32 %v2369_v27, %v4236_v37 }
 0x3e9   : > { %v2383_v31 = vrot.slane %v2375_v26, 4  ;;  %v2292_v23 = vadd.f32 %v2291_v28, %v4230_v25  ;;  %v2362_v20 = vpop.f32.mrb[34].mxu1  ;;  %v2293_v21 = vpop.f32.mrb[35].mxu0  ;;  %v2378_v24 = vmul.f32 %v2370_v2, %v4236_v37 }
 0x3ea   : > { %v2389_v3 = vrot.slane %v2376_v6, 4  ;;  %v2363_v11 = vadd.f32 %v2362_v20, %v4230_v25  ;;  %v2294_v29 = vadd.f32 %v2293_v21, %v4230_v25  ;;  %v2364_v33 = vpop.f32.mrb[35].mxu1  ;;  %v2395_v35 = vrot.slane %v2377_v32, 4 }
 0x3eb   : > { %v2384_v34 = vadd.f32 %v2383_v31, %v2375_v26  ;;  %v2371_v36 = vmax.f32 %v2292_v23, 0.0  ;;  %v2365_v30 = vadd.f32 %v2364_v33, %v4230_v25  ;;  %v2401_v40 = vrot.slane %v2378_v24, 4 }
 0x3ec   : > { %v2390_v39 = vadd.f32 %v2389_v3, %v2376_v6  ;;  %v2373_v41 = vmax.f32 %v2363_v11, 0.0  ;;  %v2372_v42 = vmax.f32 %v2294_v29, 0.0  ;;  %v2566_v45 = vpop.f32.mrb[36].mxu0  ;;  %v2396_v47 = vadd.f32 %v2395_v35, %v2377_v32 }
 0x3ed   : > { %v2385_v46 = vrot.slane %v2384_v34, 2  ;;  %v2379_v48 = vmul.f32 %v2371_v36, %v4236_v37  ;;  %v2374_v49 = vmax.f32 %v2365_v30, 0.0  ;;  %v2643_v44 = vpop.f32.mrb[36].mxu1  ;;  %v2568_v38 = vpop.f32.mrb[37].mxu0  ;;  %v2402_v50 = vadd.f32 %v2401_v40, %v2378_v24 }
 0x3ee   : > { %v2391_v43 = vrot.slane %v2390_v39, 2  ;;  %v2381_v51 = vmul.f32 %v2373_v41, %v4236_v37  ;;  %v2380_v53 = vmul.f32 %v2372_v42, %v4236_v37  ;;  %v2645_v54 = vpop.f32.mrb[37].mxu1  ;;  %v2397_v56 = vrot.slane %v2396_v47, 2 }
 0x3ef   : > { %v2386_v55 = vadd.f32 %v2385_v46, %v2384_v34  ;;  %v2407_v58 = vrot.slane %v2379_v48, 4  ;;  %v2382_v57 = vmul.f32 %v2374_v49, %v4236_v37  ;;  %v2403_v62 = vrot.slane %v2402_v50, 2 }
 0x3f0   : > { %v2392_v61 = vadd.f32 %v2391_v43, %v2390_v39  ;;  %v2419_v63 = vrot.slane %v2381_v51, 4  ;;  %v2413_v1 = vrot.slane %v2380_v53, 4  ;;  %v2572_v59 = vpop.f32.mrb[38].mxu0  ;;  %v2398_v5 = vadd.f32 %v2397_v56, %v2396_v47 }
 0x3f1   : > { %v2387_v4 = vrot.slane %v2386_v55, 1  ;;  %v2408_v7 = vadd.f32 %v2407_v58, %v2379_v48  ;;  %v2425_v14 = vrot.slane %v2382_v57, 4  ;;  %v2649_v8 = vpop.f32.mrb[38].mxu1  ;;  %v2574_v9 = vpop.f32.mrb[39].mxu0  ;;  %v2404_v15 = vadd.f32 %v2403_v62, %v2402_v50 }
 0x3f2   : > { %v2393_v10 = vrot.slane %v2392_v61, 1  ;;  %v2420_v60 = vadd.f32 %v2419_v63, %v2381_v51  ;;  %v2414_v16 = vadd.f32 %v2413_v1, %v2380_v53  ;;  %v2651_v12 = vpop.f32.mrb[39].mxu1  ;;  %v2399_v18 = vrot.slane %v2398_v5, 1 }
 0x3f3   : > { %v2388_v13 = vadd.f32 %v2387_v4, %v2386_v55  ;;  %v2409_v19 = vrot.slane %v2408_v7, 2  ;;  %v2426_v26 = vadd.f32 %v2425_v14, %v2382_v57  ;;  %v2405_v6 = vrot.slane %v2404_v15, 1 }
 0x3f4   : > { %v2394_v27 = vadd.f32 %v2393_v10, %v2392_v61  ;;  %v2421_v2 = vrot.slane %v2420_v60, 2  ;;  %v2415_v28 = vrot.slane %v2414_v16, 2  ;;  %v2720_v31 = vpop.f32.mrb[40].mxu0  ;;  %v2400_v32 = vadd.f32 %v2399_v18, %v2398_v5 }
 0x3f5   : > { %v2410_v23 = vadd.f32 %v2409_v19, %v2408_v7  ;;  %v2427_v20 = vrot.slane %v2426_v26, 2  ;;  %v2567_v21 = vadd.f32 %v2566_v45, %v4166_v17  ;;  %v2797_v3 = vpop.f32.mrb[40].mxu1  ;;  %v2722_v24 = vpop.f32.mrb[41].mxu0  ;;  %v2406_v29 = vadd.f32 %v2405_v6, %v2404_v15 }
 0x3f6   : > { %v2439_v11 = vcombine.low %v2388_v13, %v2394_v27  ;;  %v2422_v33 = vadd.f32 %v2421_v2, %v2420_v60  ;;  %v2416_v34 = vadd.f32 %v2415_v28, %v2414_v16  ;;  %v2799_v35 = vpop.f32.mrb[41].mxu1  ;;  %v2644_v39 = vadd.f32 %v2643_v44, %v4166_v17 }
 0x3f7   : > { %v2411_v36 = vrot.slane %v2410_v23, 1  ;;  %v2428_v30 = vadd.f32 %v2427_v20, %v2426_v26  ;;  %v2440_v41 = vcombine.low %v2400_v32, %v2406_v29  ;;  %v2808_v45 = vmax.f32 %v2567_v21, 0.0 }
 0x3f8   : > { %v2449_v40 = vrot.slane %v2439_v11, %v4242_v52  ;;  %v2423_v42 = vrot.slane %v2422_v33, 1  ;;  %v2417_v46 = vrot.slane %v2416_v34, 1  ;;  %v2726_v47 = vpop.f32.mrb[42].mxu0  ;;  %v2569_v43 = vadd.f32 %v2568_v38, %v4166_v17 }
 0x3f9   : > { %v2412_v48 = vadd.f32 %v2411_v36, %v2410_v23  ;;  %v2429_v49 = vrot.slane %v2428_v30, 1  ;;  %v2803_v50 = vpop.f32.mrb[42].mxu1  ;;  %v2728_v51 = vpop.f32.mrb[43].mxu0  ;;  %v2456_v53 = vrot.slane %v2440_v41, %v4242_v52  ;;  %v2646_v58 = vadd.f32 %v2645_v54, %v4166_v17  ;;  %v3838_v41 = vld [vmem:[%s4591_s3] sm:$0xff] }
 0x3fa   : > { %v2424_v55 = vadd.f32 %v2423_v42, %v2422_v33  ;;  %v2418_v56 = vadd.f32 %v2417_v46, %v2416_v34  ;;  %v2805_v44 = vpop.f32.mrb[43].mxu1  ;;  %v2810_v61 = vmax.f32 %v2644_v39, 0.0  ;;  %v2573_v62 = vadd.f32 %v2572_v59, %v4168_v22 }
 0x3fb   : > { %v2430_v57 = vadd.f32 %v2429_v49, %v2428_v30  ;;  %v2650_v63 = vadd.f32 %v2649_v8, %v4168_v22  ;;  %v2471_v1 = vcombine.low %v2449_v40, %v2456_v53  ;;  %v2809_v5 = vmax.f32 %v2569_v43, 0.0 }
 0x3fc   : > { %v2441_v4 = vcombine.low %v2412_v48, %v2418_v56  ;;  %v2575_v38 = vadd.f32 %v2574_v9, %v4168_v22  ;;  %v2816_v14 = vmax.f32 %v2573_v62, 0.0  ;;  %v2652_v15 = vadd.f32 %v2651_v12, %v4168_v22 }
 0x3fd   : > { %v2442_v7 = vcombine.low %v2424_v55, %v2430_v57  ;;  %v2818_v10 = vmax.f32 %v2650_v63, 0.0  ;;  %v2811_v54 = vmax.f32 %v2646_v58, 0.0  ;;  %v2721_v13 = vadd.f32 %v2720_v31, %v4166_v17 }
 0x3fe   : > { %v2463_v60 = vrot.slane %v2441_v4, %v4242_v52  ;;  %v2817_v16 = vmax.f32 %v2575_v38, 0.0  ;;  %v3721_v18 = vpack.c.bf16 %v2816_v14, %v2808_v45  ;;  %v2819_v19 = vmax.f32 %v2652_v15, 0.0 }
 0x3ff   : > { %v2470_v59 = vrot.slane %v2442_v7, %v4242_v52  ;;  %v3725_v8 = vpack.c.bf16 %v2818_v10, %v2810_v61  ;;  %v2798_v27 = vadd.f32 %v2797_v3, %v4166_v17  ;;  %v2723_v9 = vadd.f32 %v2722_v24, %v4166_v17 }
 0x400   : > { %v3719_v26 = vpack.c.bf16 %v2817_v16, %v2809_v5  ;;  %v3723_v2 = vpack.c.bf16 %v2819_v19, %v2811_v54  ;;  %v2800_v12 = vadd.f32 %v2799_v35, %v4166_v17  ;;  %v2727_v28 = vadd.f32 %v2726_v47, %v4168_v22 }
 0x401   : > { %v2472_v6 = vcombine.low %v2463_v60, %v2470_v59  ;;  %v2479_v32 = vrot.slane %v2471_v1, %v4242_v52  ;;  %v2804_v31 = vadd.f32 %v2803_v50, %v4168_v22  ;;  %v2729_v23 = vadd.f32 %v2728_v51, %v4168_v22 }
 0x402   : > { %3720 = vmatprep.subr.bf16.mxu0 %v3719_v26  ;;  %v2812_v21 = vmax.f32 %v2721_v13, 0.0  ;;  %v2820_v11 = vmax.f32 %v2727_v28, 0.0  ;;  %3724 = vmatprep.subr.bf16.mxu1 %v3723_v2  ;;  %v2806_v3 = vadd.f32 %v2805_v44, %v4168_v22  ;;  %v2814_v24 = vmax.f32 %v2798_v27, 0.0 }
 0x403   : > { %v2486_v20 = vrot.slane %v2472_v6, %v4242_v52  ;;  %3722 = vmatpush1.bf16.msra.mxu0 %v3721_v18  ;;  %v2813_v29 = vmax.f32 %v2723_v9, 0.0  ;;  %v2822_v17 = vmax.f32 %v2804_v31, 0.0  ;;  %v2821_v33 = vmax.f32 %v2729_v23, 0.0  ;;  %3726 = vmatpush1.bf16.msra.mxu1 %v3725_v8 }
 0x404   : > { %v2815_v35 = vmax.f32 %v2800_v12, 0.0  ;;  %v3729_v36 = vpack.c.bf16 %v2820_v11, %v2812_v21  ;;  %v2823_v30 = vmax.f32 %v2806_v3, 0.0 }
 0x405   : > { %v2487_v34 = vcombine.low %v2479_v32, %v2486_v20  ;;  %v3733_v39 = vpack.c.bf16 %v2822_v17, %v2814_v24  ;;  %v3727_v40 = vpack.c.bf16 %v2821_v33, %v2813_v29 }
 0x406   : > { %3660 = vmatmul.mubr.msk.f32.vlgmr.msra.gmra.mrb[44].mxu0 %vm599_vm1, %v3838_v41  ;;  %v3731_v22 = vpack.c.bf16 %v2823_v30, %v2815_v35  ;;  %3661 = vmatmul.mubr.msk.f32.vlgmr.msra.gmra.mrb[44].mxu1 %vm599_vm1, %v3838_v41 }
 0x407   : > { %2490 = vst [vmem:[#allocation2 + $0x2] ss:$4 sm:$0xff] %v2487_v34  ;;  %3030 = vmatprep.mubr.f32.mxu0 %v3956_v0  ;;  %3728 = vmatprep.subr.bf16.mxu0 %v3727_v40 }
 0x408   : > { %3101 = vmatprep.mubr.f32.mxu1 %v3956_v0  ;;  %3732 = vmatprep.subr.bf16.mxu1 %v3731_v22 }
 0x409   : > { %3730 = vmatpush1.bf16.msra.mxu0 %v3729_v36  ;;  %3734 = vmatpush1.bf16.msra.mxu1 %v3733_v39 }
 0x40c   : > { %3662 = vmatmul.mubr.msk.f32.vlgmr.msra.gmra.mrb[46].mxu0 %vm599_vm1, %v3838_v41  ;;  %3663 = vmatmul.mubr.msk.f32.vlgmr.msra.gmra.mrb[46].mxu1 %vm599_vm1, %v3838_v41 }
 0x4d9   : > { %v2890_v42 = vpop.f32.mrb[44].mxu0  ;;  %v2961_v47 = vpop.f32.mrb[44].mxu1 }
 0x4da   : > { %v2891_v46 = vadd.f32 %v2890_v42, %v4230_v25  ;;  %v2892_v48 = vpop.f32.mrb[45].mxu0  ;;  %v2962_v49 = vadd.f32 %v2961_v47, %v4230_v25  ;;  %v2963_v43 = vpop.f32.mrb[45].mxu1 }
 0x4db   : > { %v2893_v45 = vadd.f32 %v2892_v48, %v4230_v25  ;;  %v2964_v0 = vadd.f32 %v2963_v43, %v4230_v25 }
 0x4dc   : > { %v3108_v50 = vmax.f32 %v2891_v46, 0.0  ;;  %v3110_v51 = vmax.f32 %v2962_v49, 0.0 }
 0x4dd   : > { %v3109_v53 = vmax.f32 %v2893_v45, 0.0  ;;  %v3111_v56 = vmax.f32 %v2964_v0, 0.0 }
 0x4de   : > { %v3116_v55 = vmul.f32 %v3108_v50, %v4236_v37  ;;  %v3118_v58 = vmul.f32 %v3110_v51, %v4236_v37 }
 0x4df   : > { %v3117_v44 = vmul.f32 %v3109_v53, %v4236_v37  ;;  %v3032_v57 = vpop.f32.mrb[46].mxu0  ;;  %v3119_v62 = vmul.f32 %v3111_v56, %v4236_v37  ;;  %v3103_v1 = vpop.f32.mrb[46].mxu1 }
 0x4e0   : > { %v3124_v61 = vrot.slane %v3116_v55, 4  ;;  %v3033_v63 = vadd.f32 %v3032_v57, %v4230_v25  ;;  %v3034_v4 = vpop.f32.mrb[47].mxu0  ;;  %v3136_v5 = vrot.slane %v3118_v58, 4  ;;  %v3104_v7 = vadd.f32 %v3103_v1, %v4230_v25  ;;  %v3105_v10 = vpop.f32.mrb[47].mxu1 }
 0x4e1   : > { %v3130_v38 = vrot.slane %v3117_v44, 4  ;;  %v3035_v14 = vadd.f32 %v3034_v4, %v4230_v25  ;;  %v3142_v60 = vrot.slane %v3119_v62, 4  ;;  %v3106_v16 = vadd.f32 %v3105_v10, %v4230_v25 }
 0x4e2   : > { %v3125_v15 = vadd.f32 %v3124_v61, %v3116_v55  ;;  %v3112_v54 = vmax.f32 %v3033_v63, 0.0  ;;  %v3137_v13 = vadd.f32 %v3136_v5, %v3118_v58  ;;  %v3114_v18 = vmax.f32 %v3104_v7, 0.0 }
 0x4e3   : > { %v3131_v59 = vadd.f32 %v3130_v38, %v3117_v44  ;;  %v3113_v8 = vmax.f32 %v3035_v14, 0.0  ;;  %v3143_v26 = vadd.f32 %v3142_v60, %v3119_v62  ;;  %v3115_v9 = vmax.f32 %v3106_v16, 0.0 }
 0x4e4   : > { %v3126_v19 = vrot.slane %v3125_v15, 2  ;;  %v3120_v27 = vmul.f32 %v3112_v54, %v4236_v37  ;;  %v3138_v6 = vrot.slane %v3137_v13, 2  ;;  %v3122_v12 = vmul.f32 %v3114_v18, %v4236_v37 }
 0x4e5   : > { %v3132_v2 = vrot.slane %v3131_v59, 2  ;;  %v3121_v28 = vmul.f32 %v3113_v8, %v4236_v37  ;;  %v3144_v31 = vrot.slane %v3143_v26, 2  ;;  %v3123_v25 = vmul.f32 %v3115_v9, %v4236_v37 }
 0x4e6   : > { %v3127_v32 = vadd.f32 %v3126_v19, %v3125_v15  ;;  %v3148_v23 = vrot.slane %v3120_v27, 4  ;;  %v3139_v20 = vadd.f32 %v3138_v6, %v3137_v13  ;;  %v3160_v11 = vrot.slane %v3122_v12, 4 }
 0x4e7   : > { %v3133_v21 = vadd.f32 %v3132_v2, %v3131_v59  ;;  %v3154_v3 = vrot.slane %v3121_v28, 4  ;;  %v3145_v29 = vadd.f32 %v3144_v31, %v3143_v26  ;;  %v3166_v33 = vrot.slane %v3123_v25, 4 }
 0x4e8   : > { %v3128_v24 = vrot.slane %v3127_v32, 1  ;;  %v3149_v17 = vadd.f32 %v3148_v23, %v3120_v27  ;;  %v3140_v34 = vrot.slane %v3139_v20, 1  ;;  %v3161_v36 = vadd.f32 %v3160_v11, %v3122_v12 }
 0x4e9   : > { %v3134_v35 = vrot.slane %v3133_v21, 1  ;;  %v3155_v30 = vadd.f32 %v3154_v3, %v3121_v28  ;;  %v3146_v40 = vrot.slane %v3145_v29, 1  ;;  %v3167_v22 = vadd.f32 %v3166_v33, %v3123_v25 }
 0x4ea   : > { %v3129_v39 = vadd.f32 %v3128_v24, %v3127_v32  ;;  %v3150_v41 = vrot.slane %v3149_v17, 2  ;;  %v3141_v42 = vadd.f32 %v3140_v34, %v3139_v20  ;;  %v3162_v47 = vrot.slane %v3161_v36, 2 }
 0x4eb   : > { %v3135_v46 = vadd.f32 %v3134_v35, %v3133_v21  ;;  %v3156_v37 = vrot.slane %v3155_v30, 2  ;;  %v3147_v48 = vadd.f32 %v3146_v40, %v3145_v29  ;;  %v3168_v45 = vrot.slane %v3167_v22, 2 }
 0x4ec   : > { %v3151_v49 = vadd.f32 %v3150_v41, %v3149_v17  ;;  %v3163_v50 = vadd.f32 %v3162_v47, %v3161_v36 }
 0x4ed   : > { %v3180_v43 = vcombine.low %v3129_v39, %v3135_v46  ;;  %v3157_v0 = vadd.f32 %v3156_v37, %v3155_v30  ;;  %v3181_v51 = vcombine.low %v3141_v42, %v3147_v48  ;;  %v3169_v55 = vadd.f32 %v3168_v45, %v3167_v22 }
 0x4ee   : > { %v3152_v53 = vrot.slane %v3151_v49, 1  ;;  %v3164_v58 = vrot.slane %v3163_v50, 1 }
 0x4ef   : > { %v3190_v56 = vrot.slane %v3180_v43, %v4242_v52  ;;  %v3158_v44 = vrot.slane %v3157_v0, 1  ;;  %v3197_v57 = vrot.slane %v3181_v51, %v4242_v52  ;;  %v3170_v62 = vrot.slane %v3169_v55, 1 }
 0x4f0   : > { %v3153_v61 = vadd.f32 %v3152_v53, %v3151_v49  ;;  %v3165_v63 = vadd.f32 %v3164_v58, %v3163_v50 }
 0x4f1   : > { %v3159_v1 = vadd.f32 %v3158_v44, %v3157_v0  ;;  %v3212_v4 = vcombine.low %v3190_v56, %v3197_v57  ;;  %v3171_v5 = vadd.f32 %v3170_v62, %v3169_v55 }
 0x4f3   : > { %v3182_v38 = vcombine.low %v3153_v61, %v3159_v1  ;;  %v3183_v7 = vcombine.low %v3165_v63, %v3171_v5  ;;  %v3220_v60 = vrot.slane %v3212_v4, %v4242_v52 }
 0x4f5   : > { %v3204_v14 = vrot.slane %v3182_v38, %v4242_v52  ;;  %v3211_v10 = vrot.slane %v3183_v7, %v4242_v52 }
 0x4f7   : > { %v3213_v15 = vcombine.low %v3204_v14, %v3211_v10 }
 0x4f9   : > { %v3227_v54 = vrot.slane %v3213_v15, %v4242_v52 }
 0x4fb   : > { %v3228_v16 = vcombine.low %v3220_v60, %v3227_v54 }
 0x4fd   : > { %3231 = vst [vmem:[#allocation2 + $0x3] ss:$4 sm:$0xff] %v3228_v16 }
 0x504   : > { %v4470_v13 = vld [vmem:[#allocation2] sm:$0xff]  ;;  %v4472_v59 = vld [vmem:[#allocation2 + $0x8] sm:$0xff]  ;;  %v4474_v18 = vld [vmem:[#allocation2 + $0x10] sm:$0xff] }
 0x505   : > { %v4476_v8 = vld [vmem:[#allocation2 + $0x18] sm:$0xff]  ;;  %v3240_v19 = vcombine.high %v4470_v13, %v4470_v13  ;;  %v3241_v26 = vcombine.high %v4472_v59, %v4472_v59  ;;  %v3242_v52 = vcombine.high %v4474_v18, %v4474_v18  ;;  %v3249_v27 = vsel %vm3248_vm2, %v4470_v13, -inf }
 0x506   : > { %v3243_v9 = vcombine.high %v4476_v8, %v4476_v8  ;;  %v3250_v6 = vrot.slane %v3249_v27, 4  ;;  %v3263_v2 = vsel %vm3248_vm2, %v4472_v59, -inf  ;;  %v3277_v12 = vsel %vm3248_vm2, %v4474_v18, -inf }
 0x507   : > { %v3256_v28 = vsel %vm3248_vm2, %v3240_v19, -inf  ;;  %v3264_v32 = vrot.slane %v3263_v2, 4  ;;  %v3270_v31 = vsel %vm3248_vm2, %v3241_v26, -inf  ;;  %v3278_v23 = vrot.slane %v3277_v12, 4 }
 0x508   : > { %v3251_v25 = vmax.f32 %v3249_v27, %v3250_v6  ;;  %v3257_v20 = vrot.slane %v3256_v28, 4  ;;  %v3271_v21 = vrot.slane %v3270_v31, 4  ;;  %v3284_v11 = vsel %vm3248_vm2, %v3242_v52, -inf }
 0x509   : > { %v3265_v3 = vmax.f32 %v3263_v2, %v3264_v32  ;;  %v3279_v24 = vmax.f32 %v3277_v12, %v3278_v23  ;;  %v3285_v29 = vrot.slane %v3284_v11, 4  ;;  %v3291_v17 = vsel %vm3248_vm2, %v4476_v8, -inf }
 0x50a   : > { %v3252_v33 = vrot.slane %v3251_v25, 2  ;;  %v3258_v34 = vmax.f32 %v3256_v28, %v3257_v20  ;;  %v3272_v35 = vmax.f32 %v3270_v31, %v3271_v21  ;;  %v3292_v36 = vrot.slane %v3291_v17, 4 }
 0x50b   : > { %v3266_v30 = vrot.slane %v3265_v3, 2  ;;  %v3280_v39 = vrot.slane %v3279_v24, 2  ;;  %v3286_v40 = vmax.f32 %v3284_v11, %v3285_v29  ;;  %v3298_v41 = vsel %vm3248_vm2, %v3243_v9, -inf }
 0x50c   : > { %v3253_v22 = vmax.f32 %v3251_v25, %v3252_v33  ;;  %v3259_v42 = vrot.slane %v3258_v34, 2  ;;  %v3273_v46 = vrot.slane %v3272_v35, 2  ;;  %v3293_v47 = vmax.f32 %v3291_v17, %v3292_v36 }
 0x50d   : > { %v3267_v37 = vmax.f32 %v3265_v3, %v3266_v30  ;;  %v3281_v48 = vmax.f32 %v3279_v24, %v3280_v39  ;;  %v3287_v49 = vrot.slane %v3286_v40, 2  ;;  %v3299_v45 = vrot.slane %v3298_v41, 4 }
 0x50e   : > { %v3254_v43 = vrot.slane %v3253_v22, 1  ;;  %v3260_v50 = vmax.f32 %v3258_v34, %v3259_v42  ;;  %v3274_v0 = vmax.f32 %v3272_v35, %v3273_v46  ;;  %v3294_v51 = vrot.slane %v3293_v47, 2 }
 0x50f   : > { %v3268_v53 = vrot.slane %v3267_v37, 1  ;;  %v3282_v55 = vrot.slane %v3281_v48, 1  ;;  %v3288_v56 = vmax.f32 %v3286_v40, %v3287_v49  ;;  %v3300_v58 = vmax.f32 %v3298_v41, %v3299_v45 }
 0x510   : > { %v3261_v44 = vrot.slane %v3260_v50, 1  ;;  %v3275_v57 = vrot.slane %v3274_v0, 1  ;;  %v3295_v61 = vmax.f32 %v3293_v47, %v3294_v51  ;;  %v3255_v1 = vmax.f32 %v3253_v22, %v3254_v43 }
 0x511   : > { %v3289_v62 = vrot.slane %v3288_v56, 1  ;;  %v3301_v63 = vrot.slane %v3300_v58, 2  ;;  %v3269_v5 = vmax.f32 %v3267_v37, %v3268_v53  ;;  %v3283_v7 = vmax.f32 %v3281_v48, %v3282_v55 }
 0x512   : > { %v3262_v4 = vmax.f32 %v3260_v50, %v3261_v44  ;;  %v3276_v38 = vmax.f32 %v3274_v0, %v3275_v57  ;;  %v3296_v10 = vrot.slane %v3295_v61, 1 }
 0x513   : > { %v3290_v14 = vmax.f32 %v3288_v56, %v3289_v62  ;;  %v3302_v15 = vmax.f32 %v3300_v58, %v3301_v63 }
 0x514   : > { %v3313_v60 = vcombine.low %v3255_v1, %v3262_v4  ;;  %v3314_v54 = vcombine.low %v3269_v5, %v3276_v38  ;;  %v3297_v27 = vmax.f32 %v3295_v61, %v3296_v10 }
 0x515   : > { %v3303_v16 = vrot.slane %v3302_v15, 1  ;;  %v3315_v19 = vcombine.low %v3283_v7, %v3290_v14 }
 0x516   : > { %v3321_v26 = vsub.f32 %v4470_v13, %v3313_v60  ;;  %v3322_v52 = vsub.f32 %v4472_v59, %v3314_v54 }
 0x517   : > { %v3304_v9 = vmax.f32 %v3302_v15, %v3303_v16  ;;  %v3323_v6 = vsub.f32 %v4474_v18, %v3315_v19 }
 0x518   : > { %v3325_v2 = vmul.f32 1.442695, %v3321_v26  ;;  %v3327_v12 = vmul.f32 1.442695, %v3322_v52 }
 0x519   : > { %v3316_v28 = vcombine.low %v3297_v27, %v3304_v9  ;;  %v3329_v32 = vmul.f32 1.442695, %v3323_v6 }
 0x51a   : > { %3812 = vpow2.f32 %v3325_v2 }
 0x51b   : > { %v3324_v31 = vsub.f32 %v4476_v8, %v3316_v28  ;;  %3814 = vpow2.f32 %v3327_v12 }
 0x51c   : > { %3816 = vpow2.f32 %v3329_v32 }
 0x51d   : > { %v3331_v23 = vmul.f32 1.442695, %v3324_v31 }
 0x51f   : > { %3818 = vpow2.f32 %v3331_v23 }
 0x524   : > { %v4502_v25 = vpop.eup %3812 }
 0x525   : > { %v4504_v13 = vpop.eup %3814  ;;  %v3337_v59 = vcombine.high %v4502_v25, %v4502_v25  ;;  %v3345_v18 = vsel %vm3248_vm2, %v4502_v25, 0.0 }
 0x526   : > { %v4510_v20 = vpop.eup %3816  ;;  %v3338_v21 = vcombine.high %v4504_v13, %v4504_v13  ;;  %v3346_v8 = vrot.slane %v3345_v18, 4  ;;  %v3359_v11 = vsel %vm3248_vm2, %v4504_v13, 0.0 }
 0x527   : > { %v3339_v3 = vcombine.high %v4510_v20, %v4510_v20  ;;  %v3352_v24 = vsel %vm3248_vm2, %v3337_v59, 0.0  ;;  %v3360_v29 = vrot.slane %v3359_v11, 4  ;;  %v3373_v17 = vsel %vm3248_vm2, %v4510_v20, 0.0 }
 0x528   : > { %v3347_v33 = vadd.f32 %v3346_v8, %v3345_v18  ;;  %v3353_v34 = vrot.slane %v3352_v24, 4  ;;  %v3366_v35 = vsel %vm3248_vm2, %v3338_v21, 0.0  ;;  %v3374_v36 = vrot.slane %v3373_v17, 4 }
 0x529   : > { %v4522_v30 = vpop.eup %3818  ;;  %v3361_v39 = vadd.f32 %v3360_v29, %v3359_v11  ;;  %v3367_v40 = vrot.slane %v3366_v35, 4  ;;  %v3380_v41 = vsel %vm3248_vm2, %v3339_v3, 0.0 }
 0x52a   : > { %v3340_v22 = vcombine.high %v4522_v30, %v4522_v30  ;;  %v3348_v42 = vrot.slane %v3347_v33, 2  ;;  %v3354_v46 = vadd.f32 %v3353_v34, %v3352_v24  ;;  %v3375_v47 = vadd.f32 %v3374_v36, %v3373_v17 }
 0x52b   : > { %v3362_v37 = vrot.slane %v3361_v39, 2  ;;  %v3368_v48 = vadd.f32 %v3367_v40, %v3366_v35  ;;  %v3381_v49 = vrot.slane %v3380_v41, 4  ;;  %v3387_v45 = vsel %vm3248_vm2, %v4522_v30, 0.0 }
 0x52c   : > { %v3349_v43 = vadd.f32 %v3348_v42, %v3347_v33  ;;  %v3355_v50 = vrot.slane %v3354_v46, 2  ;;  %v3376_v0 = vrot.slane %v3375_v47, 2  ;;  %v3388_v51 = vrot.slane %v3387_v45, 4 }
 0x52d   : > { %v3363_v53 = vadd.f32 %v3362_v37, %v3361_v39  ;;  %v3369_v55 = vrot.slane %v3368_v48, 2  ;;  %v3382_v56 = vadd.f32 %v3381_v49, %v3380_v41  ;;  %v3394_v58 = vsel %vm3248_vm2, %v3340_v22, 0.0 }
 0x52e   : > { %v3350_v44 = vrot.slane %v3349_v43, 1  ;;  %v3356_v57 = vadd.f32 %v3355_v50, %v3354_v46  ;;  %v3377_v61 = vadd.f32 %v3376_v0, %v3375_v47  ;;  %v3389_v62 = vadd.f32 %v3388_v51, %v3387_v45 }
 0x52f   : > { %v3364_v63 = vrot.slane %v3363_v53, 1  ;;  %v3370_v1 = vadd.f32 %v3369_v55, %v3368_v48  ;;  %v3383_v4 = vrot.slane %v3382_v56, 2  ;;  %v3395_v5 = vrot.slane %v3394_v58, 4 }
 0x530   : > { %v3351_v38 = vadd.f32 %v3350_v44, %v3349_v43  ;;  %v3357_v7 = vrot.slane %v3356_v57, 1  ;;  %v3378_v14 = vrot.slane %v3377_v61, 1  ;;  %v3390_v10 = vrot.slane %v3389_v62, 2 }
 0x531   : > { %v3365_v15 = vadd.f32 %v3364_v63, %v3363_v53  ;;  %v3371_v60 = vrot.slane %v3370_v1, 1  ;;  %v3384_v54 = vadd.f32 %v3383_v4, %v3382_v56  ;;  %v3396_v16 = vadd.f32 %v3395_v5, %v3394_v58 }
 0x532   : > { %v3358_v19 = vadd.f32 %v3357_v7, %v3356_v57  ;;  %v3379_v26 = vadd.f32 %v3378_v14, %v3377_v61  ;;  %v3391_v52 = vadd.f32 %v3390_v10, %v3389_v62  ;;  %3820 = vrcp.f32 %v3351_v38 }
 0x533   : > { %v3372_v27 = vadd.f32 %v3371_v60, %v3370_v1  ;;  %v3385_v9 = vrot.slane %v3384_v54, 1  ;;  %v3397_v6 = vrot.slane %v3396_v16, 2  ;;  %3822 = vrcp.f32 %v3365_v15 }
 0x534   : > { %v3392_v2 = vrot.slane %v3391_v52, 1  ;;  %3824 = vrcp.f32 %v3358_v19 }
 0x535   : > { %v3386_v12 = vadd.f32 %v3385_v9, %v3384_v54  ;;  %v3398_v28 = vadd.f32 %v3397_v6, %v3396_v16  ;;  %3826 = vrcp.f32 %v3372_v27 }
 0x536   : > { %v3393_v32 = vadd.f32 %v3392_v2, %v3391_v52  ;;  %3828 = vrcp.f32 %v3379_v26 }
 0x537   : > { %v3399_v31 = vrot.slane %v3398_v28, 1  ;;  %3830 = vrcp.f32 %v3386_v12 }
 0x538   : > { %3832 = vrcp.f32 %v3393_v32 }
 0x539   : > { %v3400_v23 = vadd.f32 %v3399_v31, %v3398_v28 }
 0x53b   : > { %3834 = vrcp.f32 %v3400_v23 }
 0x53c   : > { %v3821_v59 = vpop.eup %3820 }
 0x53d   : > { %v3823_v18 = vpop.eup %3822  ;;  %v3409_v21 = vmul.f32 %v3821_v59, %v3351_v38 }
 0x53e   : > { %v3825_v8 = vpop.eup %3824  ;;  %v3411_v11 = vmul.f32 %v3823_v18, %v3365_v15 }
 0x53f   : > { %v3827_v3 = vpop.eup %3826  ;;  %v3410_v24 = vmul.f32 %v3825_v8, %v3358_v19  ;;  %v3417_v29 = vsub.f32 2.0, %v3409_v21 }
 0x540   : > { %v3829_v17 = vpop.eup %3828  ;;  %v3412_v33 = vmul.f32 %v3827_v3, %v3372_v27  ;;  %v3419_v34 = vsub.f32 2.0, %v3411_v11 }
 0x541   : > { %v3831_v35 = vpop.eup %3830  ;;  %v3413_v36 = vmul.f32 %v3829_v17, %v3379_v26  ;;  %v3418_v39 = vsub.f32 2.0, %v3410_v24  ;;  %v3425_v40 = vmul.f32 %v3821_v59, %v3417_v29 }
 0x542   : > { %v3833_v41 = vpop.eup %3832  ;;  %v3414_v22 = vmul.f32 %v3831_v35, %v3386_v12  ;;  %v3420_v42 = vsub.f32 2.0, %v3412_v33  ;;  %v3427_v46 = vmul.f32 %v3823_v18, %v3419_v34 }
 0x543   : > { %v3415_v47 = vmul.f32 %v3833_v41, %v3393_v32  ;;  %v3421_v37 = vsub.f32 2.0, %v3413_v36  ;;  %v3426_v48 = vmul.f32 %v3825_v8, %v3418_v39  ;;  %v3433_v49 = vmul.f32 %v3425_v40, %v3351_v38 }
 0x544   : > { %v3422_v45 = vsub.f32 2.0, %v3414_v22  ;;  %v3428_v43 = vmul.f32 %v3827_v3, %v3420_v42  ;;  %v3435_v50 = vmul.f32 %v3427_v46, %v3365_v15 }
 0x545   : > { %v3835_v0 = vpop.eup %3834  ;;  %v3423_v51 = vsub.f32 2.0, %v3415_v47  ;;  %v3429_v53 = vmul.f32 %v3829_v17, %v3421_v37  ;;  %v3434_v55 = vmul.f32 %v3426_v48, %v3358_v19  ;;  %v3441_v56 = vsub.f32 2.0, %v3433_v49 }
 0x546   : > { %v3416_v58 = vmul.f32 %v3835_v0, %v3400_v23  ;;  %v3430_v44 = vmul.f32 %v3831_v35, %v3422_v45  ;;  %v3436_v57 = vmul.f32 %v3428_v43, %v3372_v27  ;;  %v3443_v61 = vsub.f32 2.0, %v3435_v50 }
 0x547   : > { %v3431_v62 = vmul.f32 %v3833_v41, %v3423_v51  ;;  %v3437_v63 = vmul.f32 %v3429_v53, %v3379_v26  ;;  %v3442_v1 = vsub.f32 2.0, %v3434_v55  ;;  %v3449_v10 = vmul.f32 %v3441_v56, %v3425_v40 }
 0x548   : > { %v3424_v4 = vsub.f32 2.0, %v3416_v58  ;;  %v3438_v5 = vmul.f32 %v3430_v44, %v3386_v12  ;;  %v3444_v7 = vsub.f32 2.0, %v3436_v57  ;;  %v3451_v16 = vmul.f32 %v3443_v61, %v3427_v46 }
 0x549   : > { %v3439_v38 = vmul.f32 %v3431_v62, %v3393_v32  ;;  %v3445_v14 = vsub.f32 2.0, %v3437_v63  ;;  %v3450_v15 = vmul.f32 %v3442_v1, %v3426_v48 }
 0x54a   : > { %v3432_v60 = vmul.f32 %v3835_v0, %v3424_v4  ;;  %v3446_v54 = vsub.f32 2.0, %v3438_v5  ;;  %v3452_v19 = vmul.f32 %v3444_v7, %v3428_v43 }
 0x54b   : > { %v3447_v52 = vsub.f32 2.0, %v3439_v38  ;;  %v3465_v9 = vcombine.low %v3449_v10, %v3450_v15  ;;  %v3453_v6 = vmul.f32 %v3445_v14, %v3429_v53 }
 0x54c   : > { %v3440_v27 = vmul.f32 %v3432_v60, %v3400_v23  ;;  %v3454_v2 = vmul.f32 %v3446_v54, %v3430_v44  ;;  %v3466_v26 = vcombine.low %v3451_v16, %v3452_v19 }
 0x54d   : > { %v3473_v28 = vmul.f32 %v4502_v25, %v3465_v9  ;;  %v3455_v59 = vmul.f32 %v3447_v52, %v3431_v62 }
 0x54e   : > { %v3448_v12 = vsub.f32 2.0, %v3440_v27  ;;  %v3467_v31 = vcombine.low %v3453_v6, %v3454_v2  ;;  %v3474_v32 = vmul.f32 %v4504_v13, %v3466_v26 }
 0x54f   : > { %3477 = vst [vmem:[%s233_s12] sm:$0xff] %v3473_v28 }
 0x550   : > { %v3456_v18 = vmul.f32 %v3448_v12, %v3432_v60  ;;  %v3475_v21 = vmul.f32 %v4510_v20, %v3467_v31  ;;  %3478 = vst [vmem:[%s233_s12 + $0x8] sm:$0xff] %v3474_v32 }
 0x552   : > { %v3468_v23 = vcombine.low %v3455_v59, %v3456_v18  ;;  %3479 = vst [vmem:[%s233_s12 + $0x10] sm:$0xff] %v3475_v21 }
 0x554   : > { %v3476_v8 = vmul.f32 %v4522_v30, %v3468_v23 }
 0x556   : > { %3480 = vst [vmem:[%s233_s12 + $0x18] sm:$0xff] %v3476_v8 }
 0x557   : > { %3882 = shalt.err (!%p3879_p5)
}
 0x558   : > { %s3883_s22 = scalar_lea.hbm %s4539_s7, 512  ;;  %s3887_s26 = scalar_lea.hbm %s4592_s4, 1024 }
 0x559   : > { %p3884_p4 = scmp.ne.s32.totalorder %s4539_s7, %s3883_s22  ;;  %p3888_p12 = scmp.lt.u32.totalorder %s4539_s7, %s4592_s4 }
 0x55a   : > { %p3889_p1 = scmp.lt.u32.totalorder %s3887_s26, %s3883_s22  ;;  %p3891_p8 = scmp.lt.u32.totalorder %s3883_s22, %s4539_s7 }
 0x55b   : > { %p3885_p7 = pnand %p3884_p4, %p4600_p9 }
 0x55c   : > { %p3890_p3 = por %p3889_p1, %p3888_p12 }
 0x55d   : > { %p3886_p10 = pneg %p3885_p7 }
 0x55e   : > { %p3892_p11 = por %p3891_p8, %p3890_p3 }
 0x560   : > { %p3893_p0 = pnand %p3892_p11, %p3886_p10 }
 0x562   : > { %3896 = shalt.err (!%p3893_p0)
}
 0x563   : > { %3737 = dma.vmem_to_hbm [thread:$0]  (%p4600_p9), %s4541_s14, 512, %s4539_s7, %s3482_s8  }
 0x564 PF: > { %s3510_s12 = sand.u32 1, %s3931_s15   ;;  %p4601_p6 = scmp.ne.s32.totalorder %s4597_s30, 0 }
 0x565   : > { %p4602_p13 = scmp.ge.s32.totalorder %s3951_s20, 2  ;;  %s3511_s13 = scalar_lea.sflag [#allocation5], %s3510_s12 }
 0x567   : > { %p3744_p2 = pnand %p4602_p13, %p4601_p6 }
 0x569   : > { %3926 = dma.done.wait (!%p3744_p2), %s3511_s13, 512  }
 0x56a   : > { %3928 = vsyncadd (!%p3744_p2), %s3511_s13, 4294966784  ;;  %s20_s20 = sadd.s32 1, %s3951_s20   ;;  %s4603_s15 = smov %s3935_s16 }
 0x56b   : > { %p17_p5 = scmp.ge.s32.totalorder %s20_s20, 4   ;;  %s4604_s16 = smov %s3939_s17 }
 0x56c   : > { %s4605_s17 = smov %s4043_s29  ;;  %s4606_s18 = smov %s3947_s19 }
 0x56d   : > { %s4607_s19 = smov %s4609_s23  ;;  %19 = sbr.rel (!%p17_p5) target bundleno = 6 (0x6), region = 87 }
 0x574   :  { %3516 = vsyncpa [#allocation4], 1 }
 0x575   :  { %3518 = vsyncpa [#allocation4 + $0x1], 1 }
 0x576   :  { %3519 = vsyncpa [#allocation5], 1 }
 0x577   :  { %3521 = vsyncpa [#allocation5 + $0x1], 1 }

</bundles_post_ra>
